<compile_context>
chip_gen: v7x
topology: tpu7x:2x2x1
jax: 0.10.0
libtpu: 0.0.40
codegen_flags: <defaults>
</compile_context>

<pallas_src>
import jax
import jax.numpy as jnp
from jax.experimental import pallas as pl
from jax.experimental.pallas import tpu as pltpu


def _make_kernel(fh, fw, Ho, Wo):
    def kernel(f_ref, xp_ref, o_ref):
        # Single load + cast of the whole padded block (Hp, Wp, NB).
        xv = xp_ref[...].astype(jnp.float32)
        acc = None
        for v in range(fw):
            # One sublane-offset slice per filter column (hoisted out of the
            # row loop) -- the only slices that cross an (8,128) tile edge.
            xcol = xv[:, v:v + Wo, :]
            for u in range(fh):
                # Flipped filter tap => full-convolution ("splat") semantics.
                tap = f_ref[(fh - 1 - u) * fw + (fw - 1 - v)]
                # Leading-axis slice only: cheap vreg re-addressing.
                term = tap * xcol[u:u + Ho, :, :]
                acc = term if acc is None else acc + term
        o_ref[...] = acc.astype(o_ref.dtype)
    return kernel


def splatter_forward(x, filt):
    """Full 2-D convolution ("splatting") of each image in x with filt."""
    N, H, W = x.shape
    fh, fw = filt.shape
    Ho, Wo = H + fh - 1, W + fw - 1
    Hp, Wp = H + 2 * (fh - 1), W + 2 * (fw - 1)

    # ---- choose the lane (batch) block size -------------------------------
    lane_groups = pl.cdiv(N, 128)                       # total 128-lane groups
    per_group_bytes = (Hp * Wp + Ho * Wo) * 128 * 4     # in+out bytes / group
    target_bytes = 2 * 1024 * 1024                      # ~2 MiB per grid step
    by_bytes = max(1, target_bytes // per_group_bytes)
    # Keep >= 2 grid steps when possible so v7x's 2 TensorCores both get work.
    by_split = max(1, lane_groups // 2) if lane_groups > 1 else 1
    nb_mult = max(1, min(by_bytes, by_split, lane_groups))
    NB = 128 * nb_mult
    N_pad = pl.cdiv(N, NB) * NB

    # ---- layout plumbing: pad + batch-on-lanes transpose (wrapper side) ----
    xpad = jnp.pad(x, ((0, N_pad - N), (fh - 1, fh - 1), (fw - 1, fw - 1)))
    x_lanes = jnp.transpose(xpad, (1, 2, 0))            # (Hp, Wp, N_pad)
    filt_flat = filt.reshape(-1)                        # 1-D SMEM operand

    block_bytes = (Hp * Wp + Ho * Wo) * NB * 4
    vmem_limit = int(min(64 * 1024 * 1024,              # v7x-safe cap
                         max(32 * 1024 * 1024, 4 * block_bytes)))

    out_lanes = pl.pallas_call(
        _make_kernel(fh, fw, Ho, Wo),
        out_shape=jax.ShapeDtypeStruct((Ho, Wo, N_pad), x.dtype),
        grid=(N_pad // NB,),
        in_specs=[
            pl.BlockSpec(memory_space=pltpu.MemorySpace.SMEM),   # filter taps
            pl.BlockSpec((Hp, Wp, NB), lambda n: (0, 0, n)),     # padded images
        ],
        out_specs=pl.BlockSpec((Ho, Wo, NB), lambda n: (0, 0, n)),
        compiler_params=pltpu.CompilerParams(
            dimension_semantics=("parallel",),
            vmem_limit_bytes=vmem_limit),
    )(filt_flat, x_lanes)

    # TODO(synk): for very large images (full-image block > ~8-16 MiB on v7x),
    # add an H grid axis with an (fh-1)-row halo instead of whole-image blocks.
    return jnp.transpose(out_lanes, (2, 0, 1))[:N]      # (N, Ho, Wo)


def splatter_reference(x, filt):
    """Pure-JAX reference: full convolution via correlation with flipped filter."""
    fh, fw = filt.shape
    out = jax.lax.conv_general_dilated(
        x[:, None, :, :],
        filt[::-1, ::-1][None, None, :, :],
        window_strides=(1, 1),
        padding=[(fh - 1, fh - 1), (fw - 1, fw - 1)],
    )
    return out[:, 0]


if __name__ == "__main__":
    key = jax.random.PRNGKey(0)
    k_f, k_b, k_x = jax.random.split(key, 3)

    filter_width, filter_height = 3, 3
    # Parameters (matching torch.randn(filter_width, filter_height) / (1, 1)).
    filt = jax.random.normal(k_f, (filter_width, filter_height), jnp.float32)
    bias = jax.random.normal(k_b, (1, 1), jnp.float32)  # unused in forward

    # Input: batch of 2 single-channel 16x16 images.
    x = jax.random.normal(k_x, (2, 16, 16), jnp.float32)

    out = splatter_forward(x, filt)
    out = jax.block_until_ready(out)

    ref = splatter_reference(x, filt)
    assert out.shape == (2, 18, 18), out.shape
    assert jnp.allclose(out, ref, atol=1e-5, rtol=1e-5), "mismatch vs reference"

    print("KERNEL_OK")
</pallas_src>

<mosaic_0001>
module attributes {stable_mosaic.version = 11 : i64} {
  func.func @kernel(%arg0: i32, %arg1: memref<9xf32, #tpu.memory_space<smem>>, %arg2: memref<20x20x128xf32, #tpu.memory_space<vmem>>, %arg3: memref<18x18x128xf32, #tpu.memory_space<vmem>>) attributes {dimension_semantics = [#tpu.dimension_semantics<parallel>], iteration_bounds = array<i64: 1>, scalar_prefetch = 0 : i64, scratch_operands = 0 : i64, tpu.core_type = #tpu.core_type<tc>, window_params = [{transform_indices = @transform_0, window_bounds = array<i64: 9>}, {transform_indices = @transform_1, window_bounds = array<i64: 20, 20, 128>}, {transform_indices = @transform_2, window_bounds = array<i64: 18, 18, 128>}]} {
    %c0 = arith.constant 0 : index
    %c0_0 = arith.constant 0 : index
    %c0_1 = arith.constant 0 : index
    %0 = vector.load %arg2[%c0, %c0_0, %c0_1] : memref<20x20x128xf32, #tpu.memory_space<vmem>>, vector<20x20x128xf32>
    %1 = vector.extract_strided_slice %0 {offsets = [0, 0, 0], sizes = [20, 18, 128], strides = [1, 1, 1]} : vector<20x20x128xf32> to vector<20x18x128xf32>
    %c8 = arith.constant 8 : index
    %2 = memref.load %arg1[%c8] : memref<9xf32, #tpu.memory_space<smem>>
    %3 = vector.extract_strided_slice %1 {offsets = [0, 0, 0], sizes = [18, 18, 128], strides = [1, 1, 1]} : vector<20x18x128xf32> to vector<18x18x128xf32>
    %4 = vector.broadcast %2 : f32 to vector<18x18x128xf32>
    %5 = arith.mulf %4, %3 : vector<18x18x128xf32>
    %c5 = arith.constant 5 : index
    %6 = memref.load %arg1[%c5] : memref<9xf32, #tpu.memory_space<smem>>
    %7 = vector.extract_strided_slice %1 {offsets = [1, 0, 0], sizes = [18, 18, 128], strides = [1, 1, 1]} : vector<20x18x128xf32> to vector<18x18x128xf32>
    %8 = vector.broadcast %6 : f32 to vector<18x18x128xf32>
    %9 = arith.mulf %8, %7 : vector<18x18x128xf32>
    %10 = arith.addf %5, %9 : vector<18x18x128xf32>
    %c2 = arith.constant 2 : index
    %11 = memref.load %arg1[%c2] : memref<9xf32, #tpu.memory_space<smem>>
    %12 = vector.extract_strided_slice %1 {offsets = [2, 0, 0], sizes = [18, 18, 128], strides = [1, 1, 1]} : vector<20x18x128xf32> to vector<18x18x128xf32>
    %13 = vector.broadcast %11 : f32 to vector<18x18x128xf32>
    %14 = arith.mulf %13, %12 : vector<18x18x128xf32>
    %15 = arith.addf %10, %14 : vector<18x18x128xf32>
    %16 = vector.extract_strided_slice %0 {offsets = [0, 1, 0], sizes = [20, 18, 128], strides = [1, 1, 1]} : vector<20x20x128xf32> to vector<20x18x128xf32>
    %c7 = arith.constant 7 : index
    %17 = memref.load %arg1[%c7] : memref<9xf32, #tpu.memory_space<smem>>
    %18 = vector.extract_strided_slice %16 {offsets = [0, 0, 0], sizes = [18, 18, 128], strides = [1, 1, 1]} : vector<20x18x128xf32> to vector<18x18x128xf32>
    %19 = vector.broadcast %17 : f32 to vector<18x18x128xf32>
    %20 = arith.mulf %19, %18 : vector<18x18x128xf32>
    %21 = arith.addf %15, %20 : vector<18x18x128xf32>
    %c4 = arith.constant 4 : index
    %22 = memref.load %arg1[%c4] : memref<9xf32, #tpu.memory_space<smem>>
    %23 = vector.extract_strided_slice %16 {offsets = [1, 0, 0], sizes = [18, 18, 128], strides = [1, 1, 1]} : vector<20x18x128xf32> to vector<18x18x128xf32>
    %24 = vector.broadcast %22 : f32 to vector<18x18x128xf32>
    %25 = arith.mulf %24, %23 : vector<18x18x128xf32>
    %26 = arith.addf %21, %25 : vector<18x18x128xf32>
    %c1 = arith.constant 1 : index
    %27 = memref.load %arg1[%c1] : memref<9xf32, #tpu.memory_space<smem>>
    %28 = vector.extract_strided_slice %16 {offsets = [2, 0, 0], sizes = [18, 18, 128], strides = [1, 1, 1]} : vector<20x18x128xf32> to vector<18x18x128xf32>
    %29 = vector.broadcast %27 : f32 to vector<18x18x128xf32>
    %30 = arith.mulf %29, %28 : vector<18x18x128xf32>
    %31 = arith.addf %26, %30 : vector<18x18x128xf32>
    %32 = vector.extract_strided_slice %0 {offsets = [0, 2, 0], sizes = [20, 18, 128], strides = [1, 1, 1]} : vector<20x20x128xf32> to vector<20x18x128xf32>
    %c6 = arith.constant 6 : index
    %33 = memref.load %arg1[%c6] : memref<9xf32, #tpu.memory_space<smem>>
    %34 = vector.extract_strided_slice %32 {offsets = [0, 0, 0], sizes = [18, 18, 128], strides = [1, 1, 1]} : vector<20x18x128xf32> to vector<18x18x128xf32>
    %35 = vector.broadcast %33 : f32 to vector<18x18x128xf32>
    %36 = arith.mulf %35, %34 : vector<18x18x128xf32>
    %37 = arith.addf %31, %36 : vector<18x18x128xf32>
    %c3 = arith.constant 3 : index
    %38 = memref.load %arg1[%c3] : memref<9xf32, #tpu.memory_space<smem>>
    %39 = vector.extract_strided_slice %32 {offsets = [1, 0, 0], sizes = [18, 18, 128], strides = [1, 1, 1]} : vector<20x18x128xf32> to vector<18x18x128xf32>
    %40 = vector.broadcast %38 : f32 to vector<18x18x128xf32>
    %41 = arith.mulf %40, %39 : vector<18x18x128xf32>
    %42 = arith.addf %37, %41 : vector<18x18x128xf32>
    %c0_2 = arith.constant 0 : index
    %43 = memref.load %arg1[%c0_2] : memref<9xf32, #tpu.memory_space<smem>>
    %44 = vector.extract_strided_slice %32 {offsets = [2, 0, 0], sizes = [18, 18, 128], strides = [1, 1, 1]} : vector<20x18x128xf32> to vector<18x18x128xf32>
    %45 = vector.broadcast %43 : f32 to vector<18x18x128xf32>
    %46 = arith.mulf %45, %44 : vector<18x18x128xf32>
    %47 = arith.addf %42, %46 : vector<18x18x128xf32>
    %c0_3 = arith.constant 0 : index
    %c0_4 = arith.constant 0 : index
    %c0_5 = arith.constant 0 : index
    %48 = vector.load %arg3[%c0_3, %c0_4, %c0_5] : memref<18x18x128xf32, #tpu.memory_space<vmem>>, vector<18x18x128xf32>
    tpu.vector_store %arg3[%c0_3, %c0_4, %c0_5], %47 {strides = array<i32>} : memref<18x18x128xf32, #tpu.memory_space<vmem>>, vector<18x18x128xf32>,
    return
  }
  func.func @transform_0(%arg0: i32) -> i32 {
    %c0_i32 = arith.constant 0 : i32
    %c0_i32_0 = arith.constant 0 : i32
    return %c0_i32 : i32
  }
  func.func @transform_1(%arg0: i32) -> (i32, i32, i32) {
    %c0_i32 = arith.constant 0 : i32
    %c0_i32_0 = arith.constant 0 : i32
    %c0_i32_1 = arith.constant 0 : i32
    return %c0_i32, %c0_i32_0, %arg0 : i32, i32, i32
  }
  func.func @transform_2(%arg0: i32) -> (i32, i32, i32) {
    %c0_i32 = arith.constant 0 : i32
    %c0_i32_0 = arith.constant 0 : i32
    %c0_i32_1 = arith.constant 0 : i32
    return %c0_i32, %c0_i32_0, %arg0 : i32, i32, i32
  }
}

</mosaic_0001>

<bundles_post_ra>
// kernel: tpu_custom_call.1
= control target key start
LH: loop header
LB: loop body
LE: loop exit
PB: predicated region body
PF: predicated region fallthrough
CT: control target
= control target key end

     0   :  { %7 = vsyncpa [#allocation5], 0  ;;  %s4115_s0 = inlined_call_operand.hbm [shape: f32[9], index: 0, kind: input, shape index: {}]   ;;  %s4116_s1 = inlined_call_operand.hbm [shape: f32[20,20,128], index: 1, kind: input, shape index: {}]   ;;  %s4117_s2 = inlined_call_operand.hbm [shape: f32[18,18,128], index: 2, kind: output, shape index: {}]  }
   0x1   :  { %8 = vsyncpa [#allocation3], 0 }
   0x2   :  { %9 = vsyncpa [#allocation4], 0  ;;  %s2308_s11 = scalar_lea.hbm %s4115_s0, 16 }
   0x3   :  { %p2309_p0 = scmp.ne.s32.totalorder %s4115_s0, %s2308_s11  ;;  %p2312_p1 = scmp.lt.u32.totalorder %s2308_s11, %s4115_s0 }
   0x5   :  { %p2314_p2 = pnand %p2312_p1, %p2309_p0 }
   0x7   :  { %2317 = shalt.err (!%p2314_p2)
}
   0x8   :  { %s2368_s16 = smov [#allocation2]   ;;  %s2369_s19 = smov [#allocation6]  }
   0x9   :  { %17 = dma.hbm_to_smem %s4115_s0, 16, %s2368_s16, [#allocation5]  }
   0xa   :  { %s23_s20 = sshll.u32 %s2369_s19, 4  ;;  %s2318_s23 = scalar_lea.hbm %s4116_s1, 7680  ;;  %s24_s20 = int_to_ptr.vmem [resolvable:$true] %s23_s20 }
   0xb   :  { %p2319_p3 = scmp.ne.s32.totalorder %s4116_s1, %s2318_s23  ;;  %p2322_p4 = scmp.lt.u32.totalorder %s2318_s23, %s4116_s1 }
   0xd   :  { %p2324_p5 = pnand %p2322_p4, %p2319_p3 }
   0xf   :  { %2327 = shalt.err (!%p2324_p5)
}
  0x10   :  { %s2328_s28 = scalar_lea.vmem %s24_s20, 7680  ;;  %p2333_p7 = scmp.lt.s32.totalorder %s24_s20, %s24_s20 }
  0x11   :  { %p2329_p6 = scmp.ne.s32.totalorder %s24_s20, %s2328_s28  ;;  %p2334_p8 = scmp.lt.s32.totalorder %s2328_s28, %s2328_s28 }
  0x13   :  { %p2335_p9 = por %p2334_p8, %p2333_p7 }
  0x15   :  { %p2336_p10 = pnand %p2335_p9, %p2329_p6 }
  0x17   :  { %2339 = shalt.err (!%p2336_p10)
}
  0x18   :  { %s2370_s0 = smov 128   ;;  %s2371_s29 = smov 8  }
  0x19   :  { %29 = dma.hbm_to_vmem [thread:$0]  %s4116_s1, 7680, %s24_s20, [#allocation3], %s2370_s0, %s2370_s0, %s2371_s29  }
  0x1a   :  { %2362 = dma.done.wait [#allocation5], 16  }
  0x1b   :  { %2363 = vsyncadd [#allocation5], 4294967280 }
  0x1c   :  { %2364 = dma.done.wait [#allocation3], 7680  }
  0x1d   :  { %2365 = vsyncadd [#allocation3], 4294959616 }
  0x1e   :  { %36 = sfence }
  0x1f   :  { %s2295_s4 = sld [smem:[#allocation2 + $0x8]]  ;;  %s2296_s5 = sld [smem:[#allocation2 + $0x5]]  ;;  %v37_v0 = vld [vmem:[#allocation6] sm:$0xff]  ;;  %v38_v1 = vld [vmem:[#allocation6 + $0x8] sm:$0xff]  ;;  %v2417_v2 = vld [vmem:[#allocation6 + $0x10] sm:$0xf] }
  0x20   :  { %s2297_s6 = sld [smem:[#allocation2 + $0x2]]  ;;  %s2298_s7 = sld [smem:[#allocation2 + $0x7]]  ;;  %v2419_v3 = vld [vmem:[#allocation6 + $0x18] sm:$0xff]  ;;  %v2421_v4 = vld [vmem:[#allocation6 + $0x20] sm:$0xff]  ;;  %vm483_vm0 = vcmask 1046528   ;;  %vm1408_vm1 = vcmask 1045504  }
  0x21   :  { %s2299_s8 = sld [smem:[#allocation2 + $0x4]]  ;;  %s2300_s9 = sld [smem:[#allocation2 + $0x1]]  ;;  %v2435_v10 = vld [vmem:[#allocation6 + $0x30] sm:$0xff]  ;;  %v2453_v19 = vld [vmem:[#allocation6 + $0x38] sm:$0xff]  ;;  %v2488_v54 = vld [vmem:[#allocation6 + $0x28] sm:$0xf] }
  0x22   :  { %s2415_s10 = sld [smem:[#allocation2 + $0x6]]  ;;  %s2425_s1 = sld [smem:[#allocation2 + $0x3]]  ;;  %v2495_v60 = vld [vmem:[#allocation6 + $0x40] sm:$0xf] }
  0x23   :  { %s2443_s11 = sld [smem:[#allocation2]]  ;;  %s2372_s12 = smov [#allocation7]  }
  0x24   :  { %s2282_s13 = sshll.u32 %s2372_s12, 4  ;;  %s2283_s13 = int_to_ptr.vmem [resolvable:$true] %s2282_s13 }
  0x25   :  { %v2423_v5 = vstv %s2295_s4  ;;  %v2429_v8 = vstv %s2296_s5  ;;  %s2340_s14 = scalar_lea.vmem %s2283_s13, 6912  ;;  %p2345_p12 = scmp.lt.s32.totalorder %s2283_s13, %s2283_s13 }
  0x26   :  { %v99_v6 = vmul.f32 %v2423_v5, %v37_v0  ;;  %v100_v7 = vmul.f32 %v2423_v5, %v38_v1  ;;  %v2433_v9 = vmul.f32 %v2423_v5, %v2417_v2  ;;  %v155_v11 = vmul.f32 %v2429_v8, %v2419_v3  ;;  %p2341_p11 = scmp.ne.s32.totalorder %s2283_s13, %s2340_s14  ;;  %p2346_p13 = scmp.lt.s32.totalorder %s2340_s14, %s2340_s14 }
  0x27   :  { %v2439_v12 = vstv %s2297_s6  ;;  %v2441_v13 = vstv %s2298_s7  ;;  %v156_v14 = vmul.f32 %v2429_v8, %v2421_v4  ;;  %v2451_v18 = vstv %s2299_s8 }
  0x28   :  { %v265_v15 = vmul.f32 %v2439_v12, %v2435_v10  ;;  %v375_v16 = vmul.f32 %v2441_v13, %v37_v0  ;;  %v376_v17 = vmul.f32 %v2441_v13, %v38_v1  ;;  %v209_v20 = vadd.f32 %v155_v11, %v99_v6  ;;  %p2347_p0 = por %p2346_p13, %p2345_p12 }
  0x29   :  { %v684_v21 = vmul.f32 %v2451_v18, %v2419_v3  ;;  %v685_v22 = vmul.f32 %v2451_v18, %v2421_v4  ;;  %v2459_v23 = vstv %s2300_s9  ;;  %v2466_v31 = vstv %s2415_s10 }
  0x2a   :  { %v484_v24 = vrot.slane %v375_v16, 1  ;;  %v485_v25 = vrot.slane %v376_v17, 1  ;;  %v992_v26 = vmul.f32 %v2459_v23, %v2435_v10  ;;  %v993_v27 = vmul.f32 %v2459_v23, %v2453_v19  ;;  %p2348_p1 = pnand %p2347_p0, %p2341_p11 }
  0x2b   :  { %v319_v28 = vadd.f32 %v265_v15, %v209_v20  ;;  %v792_v29 = vrot.slane %v684_v21, 1  ;;  %v793_v30 = vrot.slane %v685_v22, 1  ;;  %v1300_v35 = vmul.f32 %v2466_v31, %v37_v0 }
  0x2c   :  { %v486_v32 = vsel %vm483_vm0, %v484_v24, %v485_v25  ;;  %v1100_v33 = vrot.slane %v992_v26, 1  ;;  %v1101_v34 = vrot.slane %v993_v27, 1  ;;  %v1301_v38 = vmul.f32 %v2466_v31, %v38_v1 }
  0x2d   :  { %v628_v36 = vadd.f32 %v486_v32, %v319_v28  ;;  %v794_v37 = vsel %vm483_vm0, %v792_v29, %v793_v30  ;;  %v2473_v39 = vstv %s2425_s1  ;;  %v1409_v41 = vrot.slane %v1300_v35, 2 }
  0x2e   :  { %v1102_v40 = vsel %vm483_vm0, %v1100_v33, %v1101_v34  ;;  %v1609_v42 = vmul.f32 %v2473_v39, %v2419_v3  ;;  %v1610_v43 = vmul.f32 %v2473_v39, %v2421_v4  ;;  %v1410_v45 = vrot.slane %v1301_v38, 2 }
  0x2f   :  { %v936_v44 = vadd.f32 %v794_v37, %v628_v36  ;;  %v2481_v46 = vstv %s2443_s11  ;;  %v210_v47 = vadd.f32 %v156_v14, %v100_v7  ;;  %v266_v55 = vmul.f32 %v2439_v12, %v2453_v19  ;;  %v2530_v36 = vld [vmem:[#allocation6 + $0x48] sm:$0xff] }
  0x30   :  { %v1717_v48 = vrot.slane %v1609_v42, 2  ;;  %v1718_v49 = vrot.slane %v1610_v43, 2  ;;  %v1917_v50 = vmul.f32 %v2481_v46, %v2435_v10  ;;  %v1918_v51 = vmul.f32 %v2481_v46, %v2453_v19 }
  0x31   :  { %v1244_v52 = vadd.f32 %v1102_v40, %v936_v44  ;;  %v1411_v53 = vsel %vm1408_vm1, %v1409_v41, %v1410_v45  ;;  %v377_v56 = vmul.f32 %v2441_v13, %v2417_v2  ;;  %v686_v61 = vmul.f32 %v2451_v18, %v2488_v54 }
  0x32   :  { %v1719_v57 = vsel %vm1408_vm1, %v1717_v48, %v1718_v49  ;;  %v2025_v58 = vrot.slane %v1917_v50, 2  ;;  %v2026_v59 = vrot.slane %v1918_v51, 2  ;;  %v320_v63 = vadd.f32 %v266_v55, %v210_v47 }
  0x33   :  { %v1553_v62 = vadd.f32 %v1411_v53, %v1244_v52  ;;  %v487_v0 = vrot.slane %v377_v56, 1  ;;  %v994_v1 = vmul.f32 %v2459_v23, %v2495_v60  ;;  %v795_v7 = vrot.slane %v686_v61, 1  ;;  %v2553_v53 = vld [vmem:[#allocation6 + $0x50] sm:$0xff] }
  0x34   :  { %v2027_v6 = vsel %vm1408_vm1, %v2025_v58, %v2026_v59  ;;  %v2504_v11 = vmul.f32 %v2466_v31, %v2417_v2  ;;  %v2508_v14 = vmul.f32 %v2473_v39, %v2488_v54  ;;  %v2513_v20 = vmul.f32 %v2481_v46, %v2495_v60 }
  0x35   :  { %v1861_v15 = vadd.f32 %v1719_v57, %v1553_v62  ;;  %v488_v16 = vsel %vm483_vm0, %v485_v25, %v487_v0  ;;  %v1103_v17 = vrot.slane %v994_v1, 1  ;;  %v796_v22 = vsel %vm483_vm0, %v793_v30, %v795_v7 }
  0x36   :  { %v629_v21 = vadd.f32 %v488_v16, %v320_v63  ;;  %v1412_v24 = vrot.slane %v2504_v11, 2  ;;  %v1720_v2 = vrot.slane %v2508_v14, 2  ;;  %v2028_v28 = vrot.slane %v2513_v20, 2 }
  0x37   :  { %v2169_v26 = vadd.f32 %v2027_v6, %v1861_v15  ;;  %v1104_v27 = vsel %vm483_vm0, %v1101_v34, %v1103_v17  ;;  %v157_v25 = vmul.f32 %v2429_v8, %v2488_v54  ;;  %v267_v30 = vmul.f32 %v2439_v12, %v2495_v60 }
  0x38   :  { %v937_v29 = vadd.f32 %v796_v22, %v629_v21  ;;  %v1413_v32 = vsel %vm1408_vm1, %v1410_v45, %v1412_v24  ;;  %v1721_v33 = vsel %vm1408_vm1, %v1718_v49, %v1720_v2  ;;  %v2029_v35 = vsel %vm1408_vm1, %v2026_v59, %v2028_v28 }
  0x39   :  { %2223 = vst [vmem:[#allocation7] sm:$0xff] %v2169_v26  ;;  %v211_v34 = vadd.f32 %v157_v25, %v2433_v9  ;;  %v102_v37 = vmul.f32 %v2423_v5, %v2419_v3  ;;  %v158_v38 = vmul.f32 %v2429_v8, %v2435_v10  ;;  %v268_v41 = vmul.f32 %v2439_v12, %v2530_v36 }
  0x3a   :  { %v1245_v40 = vadd.f32 %v1104_v27, %v937_v29  ;;  %v378_v42 = vmul.f32 %v2441_v13, %v2419_v3  ;;  %v2542_v43 = vmul.f32 %v2441_v13, %v2421_v4  ;;  %v687_v45 = vmul.f32 %v2451_v18, %v2435_v10 }
  0x3b   :  { %v321_v9 = vadd.f32 %v267_v30, %v211_v34  ;;  %v212_v44 = vadd.f32 %v158_v38, %v102_v37  ;;  %v2548_v47 = vmul.f32 %v2451_v18, %v2453_v19  ;;  %v995_v51 = vmul.f32 %v2459_v23, %v2530_v36 }
  0x3c   :  { %v1554_v48 = vadd.f32 %v1413_v32, %v1245_v40  ;;  %v489_v49 = vrot.slane %v378_v42, 1  ;;  %v490_v50 = vrot.slane %v2542_v43, 1  ;;  %v797_v56 = vrot.slane %v687_v45, 1 }
  0x3d   :  { %v630_v52 = vadd.f32 %v487_v0, %v321_v9  ;;  %v322_v55 = vadd.f32 %v268_v41, %v212_v44  ;;  %v798_v57 = vrot.slane %v2548_v47, 1  ;;  %v996_v61 = vmul.f32 %v2459_v23, %v2553_v53 }
  0x3e   :  { %v1862_v58 = vadd.f32 %v1721_v33, %v1554_v48  ;;  %v491_v59 = vsel %vm483_vm0, %v489_v49, %v490_v50  ;;  %v1105_v62 = vrot.slane %v995_v51, 1  ;;  %v1303_v0 = vmul.f32 %v2466_v31, %v2419_v3 }
  0x3f   :  { %v938_v63 = vadd.f32 %v795_v7, %v630_v52  ;;  %v631_v1 = vadd.f32 %v491_v59, %v322_v55  ;;  %v799_v6 = vsel %vm483_vm0, %v797_v56, %v798_v57  ;;  %v1106_v14 = vrot.slane %v996_v61, 1 }
  0x40   :  { %v2170_v11 = vadd.f32 %v2029_v35, %v1862_v58  ;;  %v1304_v15 = vmul.f32 %v2466_v31, %v2421_v4  ;;  %v1612_v16 = vmul.f32 %v2473_v39, %v2435_v10  ;;  %v1414_v26 = vrot.slane %v1303_v0, 2 }
  0x41   :  { %v1246_v21 = vadd.f32 %v1103_v17, %v938_v63  ;;  %v939_v22 = vadd.f32 %v799_v6, %v631_v1  ;;  %v1613_v7 = vmul.f32 %v2473_v39, %v2453_v19  ;;  %v1107_v27 = vsel %vm483_vm0, %v1105_v62, %v1106_v14 }
  0x42   :  { %2224 = vst [vmem:[#allocation7 + $0x8] sm:$0xff] %v2170_v11  ;;  %v1415_v25 = vrot.slane %v1304_v15, 2  ;;  %v1722_v29 = vrot.slane %v1612_v16, 2  ;;  %v1920_v3 = vmul.f32 %v2481_v46, %v2530_v36  ;;  %v1921_v35 = vmul.f32 %v2481_v46, %v2553_v53 }
  0x43   :  { %v1555_v32 = vadd.f32 %v1412_v24, %v1246_v21  ;;  %v1247_v33 = vadd.f32 %v1107_v27, %v939_v22  ;;  %v1723_v30 = vrot.slane %v1613_v7, 2  ;;  %v103_v37 = vmul.f32 %v2423_v5, %v2421_v4  ;;  %v2579_v24 = vld [vmem:[#allocation6 + $0x58] sm:$0xf] }
  0x44   :  { %v1416_v17 = vsel %vm1408_vm1, %v1414_v26, %v1415_v25  ;;  %v2030_v34 = vrot.slane %v1920_v3, 2  ;;  %v159_v38 = vmul.f32 %v2429_v8, %v2453_v19  ;;  %v2031_v43 = vrot.slane %v1921_v35, 2  ;;  %v2623_v26 = vld [vmem:[#allocation6 + $0x60] sm:$0xff] }
  0x45   :  { %v1863_v40 = vadd.f32 %v1720_v2, %v1555_v32  ;;  %v1556_v41 = vadd.f32 %v1416_v17, %v1247_v33  ;;  %v1724_v42 = vsel %vm1408_vm1, %v1722_v29, %v1723_v30  ;;  %v269_v44 = vmul.f32 %v2439_v12, %v2553_v53 }
  0x46   :  { %v213_v9 = vadd.f32 %v159_v38, %v103_v37  ;;  %v380_v45 = vmul.f32 %v2441_v13, %v2488_v54  ;;  %v689_v4 = vmul.f32 %v2451_v18, %v2495_v60  ;;  %v2032_v48 = vsel %vm1408_vm1, %v2030_v34, %v2031_v43 }
  0x47   :  { %v2171_v47 = vadd.f32 %v2028_v28, %v1863_v40  ;;  %v1864_v2 = vadd.f32 %v1724_v42, %v1556_v41  ;;  %v997_v49 = vmul.f32 %v2459_v23, %v2579_v24  ;;  %v2594_v56 = vmul.f32 %v2466_v31, %v2488_v54  ;;  %v2644_v41 = vld [vmem:[#allocation6 + $0x68] sm:$0xff] }
  0x48   :  { %v323_v51 = vadd.f32 %v269_v44, %v213_v9  ;;  %v492_v52 = vrot.slane %v380_v45, 1  ;;  %v800_v55 = vrot.slane %v689_v4, 1  ;;  %v2598_v20 = vmul.f32 %v2473_v39, %v2495_v60 }
  0x49   :  { %2225 = vst [vmem:[#allocation7 + $0x10] sm:$0x3] %v2171_v47  ;;  %v2172_v58 = vadd.f32 %v2032_v48, %v1864_v2  ;;  %v1108_v59 = vrot.slane %v997_v49, 1  ;;  %v2602_v28 = vmul.f32 %v2481_v46, %v2579_v24  ;;  %v1417_v63 = vrot.slane %v2594_v56, 2 }
  0x4a   :  { %v493_v61 = vsel %vm483_vm0, %v490_v50, %v492_v52  ;;  %v801_v62 = vsel %vm483_vm0, %v798_v57, %v800_v55  ;;  %v104_v1 = vmul.f32 %v2423_v5, %v2488_v54  ;;  %v1725_v11 = vrot.slane %v2598_v20, 2 }
  0x4b   :  { %2226 = vst [vmem:[#allocation7 + $0x18] sm:$0xff] %v2172_v58  ;;  %v632_v6 = vadd.f32 %v493_v61, %v323_v51  ;;  %v1109_v0 = vsel %vm483_vm0, %v1106_v14, %v1108_v59  ;;  %v2033_v15 = vrot.slane %v2602_v28, 2  ;;  %v1418_v16 = vsel %vm1408_vm1, %v1415_v25, %v1417_v63 }
  0x4c   :  { %v160_v50 = vmul.f32 %v2429_v8, %v2495_v60  ;;  %v270_v57 = vmul.f32 %v2439_v12, %v2579_v24  ;;  %v105_v21 = vmul.f32 %v2423_v5, %v2435_v10  ;;  %v1726_v22 = vsel %vm1408_vm1, %v1723_v30, %v1725_v11 }
  0x4d   :  { %v940_v54 = vadd.f32 %v801_v62, %v632_v6  ;;  %v2034_v14 = vsel %vm1408_vm1, %v2031_v43, %v2033_v15  ;;  %v161_v7 = vmul.f32 %v2429_v8, %v2530_v36  ;;  %v271_v25 = vmul.f32 %v2439_v12, %v2623_v26 }
  0x4e   :  { %v214_v27 = vadd.f32 %v160_v50, %v104_v1  ;;  %v381_v29 = vmul.f32 %v2441_v13, %v2435_v10  ;;  %v2633_v3 = vmul.f32 %v2441_v13, %v2453_v19  ;;  %v690_v30 = vmul.f32 %v2451_v18, %v2530_v36 }
  0x4f   :  { %v1248_v32 = vadd.f32 %v1109_v0, %v940_v54  ;;  %v215_v33 = vadd.f32 %v161_v7, %v105_v21  ;;  %v2639_v35 = vmul.f32 %v2451_v18, %v2553_v53  ;;  %v998_v38 = vmul.f32 %v2459_v23, %v2623_v26 }
  0x50   :  { %v324_v17 = vadd.f32 %v270_v57, %v214_v27  ;;  %v494_v34 = vrot.slane %v381_v29, 1  ;;  %v495_v37 = vrot.slane %v2633_v3, 1  ;;  %v802_v43 = vrot.slane %v690_v30, 1 }
  0x51   :  { %v1557_v40 = vadd.f32 %v1418_v16, %v1248_v32  ;;  %v325_v42 = vadd.f32 %v271_v25, %v215_v33  ;;  %v803_v9 = vrot.slane %v2639_v35, 1  ;;  %v999_v4 = vmul.f32 %v2459_v23, %v2644_v41  ;;  %v2670_v33 = vld [vmem:[#allocation6 + $0x70] sm:$0xf] }
  0x52   :  { %v633_v44 = vadd.f32 %v492_v52, %v324_v17  ;;  %v496_v45 = vsel %vm483_vm0, %v494_v34, %v495_v37  ;;  %v1110_v47 = vrot.slane %v998_v38, 1  ;;  %v1306_v51 = vmul.f32 %v2466_v31, %v2435_v10 }
  0x53   :  { %v1865_v2 = vadd.f32 %v1726_v22, %v1557_v40  ;;  %v634_v48 = vadd.f32 %v496_v45, %v325_v42  ;;  %v804_v49 = vsel %vm483_vm0, %v802_v43, %v803_v9  ;;  %v1111_v58 = vrot.slane %v999_v4, 1 }
  0x54   :  { %v941_v56 = vadd.f32 %v800_v55, %v633_v44  ;;  %v1307_v20 = vmul.f32 %v2466_v31, %v2453_v19  ;;  %v1615_v52 = vmul.f32 %v2473_v39, %v2530_v36  ;;  %v1419_v1 = vrot.slane %v1306_v51, 2 }
  0x55   :  { %v2173_v61 = vadd.f32 %v2034_v14, %v1865_v2  ;;  %v942_v62 = vadd.f32 %v804_v49, %v634_v48  ;;  %v1616_v6 = vmul.f32 %v2473_v39, %v2553_v53  ;;  %v1112_v16 = vsel %vm483_vm0, %v1110_v47, %v1111_v58 }
  0x56   :  { %v1249_v0 = vadd.f32 %v1108_v59, %v941_v56  ;;  %v1420_v50 = vrot.slane %v1307_v20, 2  ;;  %v1727_v57 = vrot.slane %v1615_v52, 2  ;;  %v1923_v21 = vmul.f32 %v2481_v46, %v2623_v26 }
  0x57   :  { %2227 = vst [vmem:[#allocation7 + $0x20] sm:$0xff] %v2173_v61  ;;  %v1250_v10 = vadd.f32 %v1112_v16, %v942_v62  ;;  %v1728_v55 = vrot.slane %v1616_v6, 2  ;;  %v1924_v54 = vmul.f32 %v2481_v46, %v2644_v41  ;;  %v106_v7 = vmul.f32 %v2423_v5, %v2453_v19  ;;  %v2709_v6 = vld [vmem:[#allocation6 + $0x78] sm:$0xff] }
  0x58   :  { %v1558_v22 = vadd.f32 %v1417_v63, %v1249_v0  ;;  %v1421_v14 = vsel %vm1408_vm1, %v1419_v1, %v1420_v50  ;;  %v162_v59 = vmul.f32 %v2429_v8, %v2553_v53  ;;  %v2035_v29 = vrot.slane %v1923_v21, 2 }
  0x59   :  { %v1559_v27 = vadd.f32 %v1421_v14, %v1250_v10  ;;  %v1729_v25 = vsel %vm1408_vm1, %v1727_v57, %v1728_v55  ;;  %v2036_v3 = vrot.slane %v1924_v54, 2  ;;  %v272_v63 = vmul.f32 %v2439_v12, %v2644_v41 }
  0x5a   :  { %v1866_v32 = vadd.f32 %v1725_v11, %v1558_v22  ;;  %v216_v30 = vadd.f32 %v162_v59, %v106_v7  ;;  %v383_v35 = vmul.f32 %v2441_v13, %v2495_v60  ;;  %v692_v34 = vmul.f32 %v2451_v18, %v2579_v24 }
  0x5b   :  { %v1867_v17 = vadd.f32 %v1729_v25, %v1559_v27  ;;  %v2037_v19 = vsel %vm1408_vm1, %v2035_v29, %v2036_v3  ;;  %v1000_v38 = vmul.f32 %v2459_v23, %v2670_v33  ;;  %v2685_v43 = vmul.f32 %v2466_v31, %v2495_v60  ;;  %v2734_v25 = vld [vmem:[#allocation6 + $0x80] sm:$0xff] }
  0x5c   :  { %v2174_v11 = vadd.f32 %v2033_v15, %v1866_v32  ;;  %v326_v40 = vadd.f32 %v272_v63, %v216_v30  ;;  %v497_v42 = vrot.slane %v383_v35, 1  ;;  %v805_v45 = vrot.slane %v692_v34, 1 }
  0x5d   :  { %v2175_v44 = vadd.f32 %v2037_v19, %v1867_v17  ;;  %v1113_v4 = vrot.slane %v1000_v38, 1  ;;  %v2689_v47 = vmul.f32 %v2473_v39, %v2579_v24  ;;  %v1422_v48 = vrot.slane %v2685_v43, 2 }
  0x5e   :  { %2228 = vst [vmem:[#allocation7 + $0x28] sm:$0x3] %v2174_v11  ;;  %v498_v2 = vsel %vm483_vm0, %v495_v37, %v497_v42  ;;  %v2695_v28 = vmul.f32 %v2481_v46, %v2670_v33  ;;  %v107_v15 = vmul.f32 %v2423_v5, %v2495_v60  ;;  %v806_v51 = vsel %vm483_vm0, %v803_v9, %v805_v45 }
  0x5f   :  { %2229 = vst [vmem:[#allocation7 + $0x30] sm:$0xff] %v2175_v44  ;;  %v635_v49 = vadd.f32 %v498_v2, %v326_v40  ;;  %v1114_v56 = vsel %vm483_vm0, %v1111_v58, %v1113_v4  ;;  %v1730_v20 = vrot.slane %v2689_v47, 2  ;;  %v1423_v52 = vsel %vm1408_vm1, %v1420_v50, %v1422_v48 }
  0x60   :  { %v2038_v37 = vrot.slane %v2695_v28, 2  ;;  %v163_v61 = vmul.f32 %v2429_v8, %v2579_v24  ;;  %v273_v62 = vmul.f32 %v2439_v12, %v2670_v33  ;;  %v108_v9 = vmul.f32 %v2423_v5, %v2530_v36 }
  0x61   :  { %v943_v1 = vadd.f32 %v806_v51, %v635_v49  ;;  %v1731_v60 = vsel %vm1408_vm1, %v1728_v55, %v1730_v20  ;;  %v164_v58 = vmul.f32 %v2429_v8, %v2623_v26  ;;  %v274_v50 = vmul.f32 %v2439_v12, %v2709_v6 }
  0x62   :  { %v2039_v0 = vsel %vm1408_vm1, %v2036_v3, %v2038_v37  ;;  %v217_v16 = vadd.f32 %v163_v61, %v107_v15  ;;  %v384_v57 = vmul.f32 %v2441_v13, %v2530_v36  ;;  %v2724_v21 = vmul.f32 %v2441_v13, %v2553_v53 }
  0x63   :  { %v1251_v10 = vadd.f32 %v1114_v56, %v943_v1  ;;  %v218_v55 = vadd.f32 %v164_v58, %v108_v9  ;;  %v693_v54 = vmul.f32 %v2451_v18, %v2623_v26  ;;  %v2730_v7 = vmul.f32 %v2451_v18, %v2644_v41 }
  0x64   :  { %v327_v22 = vadd.f32 %v273_v62, %v217_v16  ;;  %v499_v14 = vrot.slane %v384_v57, 1  ;;  %v1001_v59 = vmul.f32 %v2459_v23, %v2709_v6  ;;  %v500_v3 = vrot.slane %v2724_v21, 1 }
  0x65   :  { %v1560_v27 = vadd.f32 %v1423_v52, %v1251_v10  ;;  %v328_v29 = vadd.f32 %v274_v50, %v218_v55  ;;  %v807_v32 = vrot.slane %v693_v54, 1  ;;  %v808_v63 = vrot.slane %v2730_v7, 1  ;;  %v2763_v54 = vld [vmem:[#allocation6 + $0x88] sm:$0xf] }
  0x66   :  { %v636_v30 = vadd.f32 %v497_v42, %v327_v22  ;;  %v1002_v35 = vmul.f32 %v2459_v23, %v2734_v25  ;;  %v1115_v17 = vrot.slane %v1001_v59, 1  ;;  %v501_v34 = vsel %vm483_vm0, %v499_v14, %v500_v3 }
  0x67   :  { %v1868_v19 = vadd.f32 %v1731_v60, %v1560_v27  ;;  %v1309_v38 = vmul.f32 %v2466_v31, %v2530_v36  ;;  %v1310_v11 = vmul.f32 %v2466_v31, %v2553_v53  ;;  %v637_v43 = vadd.f32 %v501_v34, %v328_v29 }
  0x68   :  { %v944_v40 = vadd.f32 %v805_v45, %v636_v30  ;;  %v809_v44 = vsel %vm483_vm0, %v807_v32, %v808_v63  ;;  %v1116_v42 = vrot.slane %v1002_v35, 1  ;;  %v1618_v49 = vmul.f32 %v2473_v39, %v2623_v26 }
  0x69   :  { %v2176_v47 = vadd.f32 %v2039_v0, %v1868_v19  ;;  %v1424_v2 = vrot.slane %v1309_v38, 2  ;;  %v1425_v15 = vrot.slane %v1310_v11, 2  ;;  %v945_v56 = vadd.f32 %v809_v44, %v637_v43 }
  0x6a   :  { %v1252_v51 = vadd.f32 %v1113_v4, %v944_v40  ;;  %v1117_v52 = vsel %vm483_vm0, %v1115_v17, %v1116_v42  ;;  %v1619_v36 = vmul.f32 %v2473_v39, %v2644_v41  ;;  %v1732_v61 = vrot.slane %v1618_v49, 2 }
  0x6b   :  { %2230 = vst [vmem:[#allocation7 + $0x38] sm:$0xff] %v2176_v47  ;;  %v1426_v45 = vsel %vm1408_vm1, %v1424_v2, %v1425_v15  ;;  %v1926_v62 = vmul.f32 %v2481_v46, %v2709_v6  ;;  %v1927_v1 = vmul.f32 %v2481_v46, %v2734_v25  ;;  %v1253_v9 = vadd.f32 %v1117_v52, %v945_v56 }
  0x6c   :  { %v1561_v60 = vadd.f32 %v1422_v48, %v1252_v51  ;;  %v1733_v58 = vrot.slane %v1619_v36, 2  ;;  %v109_v4 = vmul.f32 %v2423_v5, %v2553_v53  ;;  %v165_v50 = vmul.f32 %v2429_v8, %v2644_v41 }
  0x6d   :  { %v2040_v0 = vrot.slane %v1926_v62, 2  ;;  %v2041_v16 = vrot.slane %v1927_v1, 2  ;;  %v275_v57 = vmul.f32 %v2439_v12, %v2734_v25  ;;  %v1562_v55 = vadd.f32 %v1426_v45, %v1253_v9 }
  0x6e   :  { %v1869_v10 = vadd.f32 %v1730_v20, %v1561_v60  ;;  %v1734_v21 = vsel %vm1408_vm1, %v1732_v61, %v1733_v58  ;;  %v386_v48 = vmul.f32 %v2441_v13, %v2579_v24  ;;  %v219_v53 = vadd.f32 %v165_v50, %v109_v4 }
  0x6f   :  { %v2042_v22 = vsel %vm1408_vm1, %v2040_v0, %v2041_v16  ;;  %v695_v14 = vmul.f32 %v2451_v18, %v2670_v33  ;;  %v1003_v7 = vmul.f32 %v2459_v23, %v2763_v54  ;;  %v1870_v59 = vadd.f32 %v1734_v21, %v1562_v55 }
  0x70   :  { %v2177_v20 = vadd.f32 %v2038_v37, %v1869_v10  ;;  %v502_v27 = vrot.slane %v386_v48, 1  ;;  %v2776_v29 = vmul.f32 %v2466_v31, %v2579_v24  ;;  %v329_v32 = vadd.f32 %v275_v57, %v219_v53 }
  0x71   :  { %v810_v30 = vrot.slane %v695_v14, 1  ;;  %v1118_v35 = vrot.slane %v1003_v7, 1  ;;  %v2780_v17 = vmul.f32 %v2473_v39, %v2670_v33  ;;  %v2178_v19 = vadd.f32 %v2042_v22, %v1870_v59 }
  0x72   :  { %2231 = vst [vmem:[#allocation7 + $0x40] sm:$0x3] %v2177_v20  ;;  %v503_v34 = vsel %vm483_vm0, %v500_v3, %v502_v27  ;;  %v1427_v28 = vrot.slane %v2776_v29, 2  ;;  %v2786_v37 = vmul.f32 %v2481_v46, %v2763_v54  ;;  %v110_v3 = vmul.f32 %v2423_v5, %v2579_v24 }
  0x73   :  { %v638_v38 = vadd.f32 %v503_v34, %v329_v32  ;;  %v811_v11 = vsel %vm483_vm0, %v808_v63, %v810_v30  ;;  %v1119_v40 = vsel %vm483_vm0, %v1116_v42, %v1118_v35  ;;  %v1735_v43 = vrot.slane %v2780_v17, 2  ;;  %2232 = vst [vmem:[#allocation7 + $0x48] sm:$0xff] %v2178_v19  ;;  %v2800_v42 = vld [vmem:[#allocation6 + $0x90] sm:$0xff] }
  0x74   :  { %v1428_v44 = vsel %vm1408_vm1, %v1425_v15, %v1427_v28  ;;  %v2043_v47 = vrot.slane %v2786_v37, 2  ;;  %v166_v2 = vmul.f32 %v2429_v8, %v2670_v33  ;;  %v276_v63 = vmul.f32 %v2439_v12, %v2763_v54 }
  0x75   :  { %v946_v49 = vadd.f32 %v811_v11, %v638_v38  ;;  %v1736_v51 = vsel %vm1408_vm1, %v1733_v58, %v1735_v43  ;;  %v111_v56 = vmul.f32 %v2423_v5, %v2623_v26  ;;  %v167_v24 = vmul.f32 %v2429_v8, %v2709_v6 }
  0x76   :  { %v2044_v15 = vsel %vm1408_vm1, %v2041_v16, %v2043_v47  ;;  %v220_v52 = vadd.f32 %v166_v2, %v110_v3  ;;  %v277_v36 = vmul.f32 %v2439_v12, %v2800_v42  ;;  %v387_v61 = vmul.f32 %v2441_v13, %v2623_v26  ;;  %v2825_v16 = vld [vmem:[#allocation6 + $0x98] sm:$0xff] }
  0x77   :  { %v1254_v45 = vadd.f32 %v1119_v40, %v946_v49  ;;  %v2815_v62 = vmul.f32 %v2441_v13, %v2644_v41  ;;  %v696_v1 = vmul.f32 %v2451_v18, %v2709_v6  ;;  %v221_v9 = vadd.f32 %v167_v24, %v111_v56 }
  0x78   :  { %v330_v60 = vadd.f32 %v276_v63, %v220_v52  ;;  %v2821_v58 = vmul.f32 %v2451_v18, %v2734_v25  ;;  %v1004_v4 = vmul.f32 %v2459_v23, %v2800_v42  ;;  %v504_v50 = vrot.slane %v387_v61, 1 }
  0x79   :  { %v1563_v0 = vadd.f32 %v1428_v44, %v1254_v45  ;;  %v505_v57 = vrot.slane %v2815_v62, 1  ;;  %v812_v10 = vrot.slane %v696_v1, 1  ;;  %v331_v21 = vadd.f32 %v277_v36, %v221_v9 }
  0x7a   :  { %v639_v55 = vadd.f32 %v502_v27, %v330_v60  ;;  %v813_v48 = vrot.slane %v2821_v58, 1  ;;  %v1005_v22 = vmul.f32 %v2459_v23, %v2825_v16  ;;  %v1120_v7 = vrot.slane %v1004_v4, 1  ;;  %v2855_v60 = vld [vmem:[#allocation6 + $0xa0] sm:$0xf] }
  0x7b   :  { %v1871_v53 = vadd.f32 %v1736_v51, %v1563_v0  ;;  %v506_v14 = vsel %vm483_vm0, %v504_v50, %v505_v57  ;;  %v1312_v20 = vmul.f32 %v2466_v31, %v2623_v26  ;;  %v1313_v27 = vmul.f32 %v2466_v31, %v2644_v41 }
  0x7c   :  { %v947_v59 = vadd.f32 %v810_v30, %v639_v55  ;;  %v640_v29 = vadd.f32 %v506_v14, %v331_v21  ;;  %v814_v32 = vsel %vm483_vm0, %v812_v10, %v813_v48  ;;  %v1121_v17 = vrot.slane %v1005_v22, 1 }
  0x7d   :  { %v2179_v19 = vadd.f32 %v2044_v15, %v1871_v53  ;;  %v1429_v34 = vrot.slane %v1312_v20, 2  ;;  %v1621_v38 = vmul.f32 %v2473_v39, %v2709_v6  ;;  %v1622_v26 = vmul.f32 %v2473_v39, %v2734_v25 }
  0x7e   :  { %v1255_v11 = vadd.f32 %v1118_v35, %v947_v59  ;;  %v948_v40 = vadd.f32 %v814_v32, %v640_v29  ;;  %v1122_v44 = vsel %vm483_vm0, %v1120_v7, %v1121_v17  ;;  %v1430_v30 = vrot.slane %v1313_v27, 2 }
  0x7f   :  { %2233 = vst [vmem:[#allocation7 + $0x50] sm:$0xff] %v2179_v19  ;;  %v1737_v3 = vrot.slane %v1621_v38, 2  ;;  %v1929_v2 = vmul.f32 %v2481_v46, %v2800_v42  ;;  %v1930_v49 = vmul.f32 %v2481_v46, %v2825_v16  ;;  %v1738_v56 = vrot.slane %v1622_v26, 2 }
  0x80   :  { %v1564_v51 = vadd.f32 %v1427_v28, %v1255_v11  ;;  %v1256_v63 = vadd.f32 %v1122_v44, %v948_v40  ;;  %v112_v35 = vmul.f32 %v2423_v5, %v2644_v41  ;;  %v1431_v15 = vsel %vm1408_vm1, %v1429_v34, %v1430_v30  ;;  %v2896_v11 = vld [vmem:[#allocation6 + $0xa8] sm:$0xff] }
  0x81   :  { %v2045_v52 = vrot.slane %v1929_v2, 2  ;;  %v2046_v24 = vrot.slane %v1930_v49, 2  ;;  %v168_v36 = vmul.f32 %v2429_v8, %v2734_v25  ;;  %v1739_v62 = vsel %vm1408_vm1, %v1737_v3, %v1738_v56 }
  0x82   :  { %v1872_v45 = vadd.f32 %v1735_v43, %v1564_v51  ;;  %v1565_v61 = vadd.f32 %v1431_v15, %v1256_v63  ;;  %v278_v1 = vmul.f32 %v2439_v12, %v2825_v16  ;;  %v389_v41 = vmul.f32 %v2441_v13, %v2670_v33 }
  0x83   :  { %v2047_v28 = vsel %vm1408_vm1, %v2045_v52, %v2046_v24  ;;  %v222_v9 = vadd.f32 %v168_v36, %v112_v35  ;;  %v698_v58 = vmul.f32 %v2451_v18, %v2763_v54  ;;  %v2865_v0 = vmul.f32 %v2459_v23, %v2855_v60  ;;  %v2921_v52 = vld [vmem:[#allocation6 + $0xb0] sm:$0xff] }
  0x84   :  { %v2180_v43 = vadd.f32 %v2043_v47, %v1872_v45  ;;  %v1873_v4 = vadd.f32 %v1739_v62, %v1565_v61  ;;  %v2869_v50 = vmul.f32 %v2466_v31, %v2670_v33  ;;  %v507_v55 = vrot.slane %v389_v41, 1 }
  0x85   :  { %v332_v10 = vadd.f32 %v278_v1, %v222_v9  ;;  %v815_v21 = vrot.slane %v698_v58, 1  ;;  %v2873_v22 = vmul.f32 %v2473_v39, %v2763_v54  ;;  %v1123_v37 = vrot.slane %v2865_v0, 1 }
  0x86   :  { %2234 = vst [vmem:[#allocation7 + $0x58] sm:$0x3] %v2180_v43  ;;  %v2181_v53 = vadd.f32 %v2047_v28, %v1873_v4  ;;  %v1432_v47 = vrot.slane %v2869_v50, 2  ;;  %v2879_v14 = vmul.f32 %v2481_v46, %v2855_v60  ;;  %v508_v7 = vsel %vm483_vm0, %v505_v57, %v507_v55 }
  0x87   :  { %v816_v20 = vsel %vm483_vm0, %v813_v48, %v815_v21  ;;  %v1740_v59 = vrot.slane %v2873_v22, 2  ;;  %v113_v29 = vmul.f32 %v2423_v5, %v2670_v33  ;;  %v641_v32 = vadd.f32 %v508_v7, %v332_v10 }
  0x88   :  { %2235 = vst [vmem:[#allocation7 + $0x60] sm:$0xff] %v2181_v53  ;;  %v1124_v19 = vsel %vm483_vm0, %v1121_v17, %v1123_v37  ;;  %v1433_v27 = vsel %vm1408_vm1, %v1430_v30, %v1432_v47  ;;  %v2048_v34 = vrot.slane %v2879_v14, 2  ;;  %v169_v57 = vmul.f32 %v2429_v8, %v2763_v54 }
  0x89   :  { %v1741_v38 = vsel %vm1408_vm1, %v1738_v56, %v1740_v59  ;;  %v279_v48 = vmul.f32 %v2439_v12, %v2855_v60  ;;  %v114_v33 = vmul.f32 %v2423_v5, %v2709_v6  ;;  %v949_v17 = vadd.f32 %v816_v20, %v641_v32 }
  0x8a   :  { %v2049_v40 = vsel %vm1408_vm1, %v2046_v24, %v2048_v34  ;;  %v170_v44 = vmul.f32 %v2429_v8, %v2800_v42  ;;  %v280_v26 = vmul.f32 %v2439_v12, %v2896_v11  ;;  %v223_v30 = vadd.f32 %v169_v57, %v113_v29 }
  0x8b   :  { %v390_v3 = vmul.f32 %v2441_v13, %v2709_v6  ;;  %v2911_v2 = vmul.f32 %v2441_v13, %v2734_v25  ;;  %v699_v49 = vmul.f32 %v2451_v18, %v2800_v42  ;;  %v1257_v51 = vadd.f32 %v1124_v19, %v949_v17 }
  0x8c   :  { %v224_v63 = vadd.f32 %v170_v44, %v114_v33  ;;  %v2917_v56 = vmul.f32 %v2451_v18, %v2825_v16  ;;  %v1007_v35 = vmul.f32 %v2459_v23, %v2896_v11  ;;  %v333_v15 = vadd.f32 %v279_v48, %v223_v30 }
  0x8d   :  { %v509_v24 = vrot.slane %v390_v3, 1  ;;  %v510_v36 = vrot.slane %v2911_v2, 1  ;;  %v817_v45 = vrot.slane %v699_v49, 1  ;;  %v1566_v61 = vadd.f32 %v1433_v27, %v1257_v51 }
  0x8e   :  { %v334_v62 = vadd.f32 %v280_v26, %v224_v63  ;;  %v818_v1 = vrot.slane %v2917_v56, 1  ;;  %v1008_v28 = vmul.f32 %v2459_v23, %v2921_v52  ;;  %v642_v9 = vadd.f32 %v507_v55, %v333_v15  ;;  %v2952_v56 = vld [vmem:[#allocation6 + $0xb8] sm:$0xf] }
  0x8f   :  { %v511_v41 = vsel %vm483_vm0, %v509_v24, %v510_v36  ;;  %v1125_v58 = vrot.slane %v1007_v35, 1  ;;  %v1315_v43 = vmul.f32 %v2466_v31, %v2709_v6  ;;  %v1874_v4 = vadd.f32 %v1741_v38, %v1566_v61 }
  0x90   :  { %v643_v0 = vadd.f32 %v511_v41, %v334_v62  ;;  %v819_v50 = vsel %vm483_vm0, %v817_v45, %v818_v1  ;;  %v1126_v10 = vrot.slane %v1008_v28, 1  ;;  %v950_v53 = vadd.f32 %v815_v21, %v642_v9 }
  0x91   :  { %v1316_v7 = vmul.f32 %v2466_v31, %v2734_v25  ;;  %v1434_v20 = vrot.slane %v1315_v43, 2  ;;  %v1624_v29 = vmul.f32 %v2473_v39, %v2800_v42  ;;  %v2182_v55 = vadd.f32 %v2049_v40, %v1874_v4 }
  0x92   :  { %v951_v32 = vadd.f32 %v819_v50, %v643_v0  ;;  %v1127_v19 = vsel %vm483_vm0, %v1125_v58, %v1126_v10  ;;  %v1625_v6 = vmul.f32 %v2473_v39, %v2825_v16  ;;  %v1258_v27 = vadd.f32 %v1123_v37, %v950_v53 }
  0x93   :  { %v1435_v38 = vrot.slane %v1316_v7, 2  ;;  %v1742_v57 = vrot.slane %v1624_v29, 2  ;;  %v1932_v21 = vmul.f32 %v2481_v46, %v2896_v11  ;;  %2236 = vst [vmem:[#allocation7 + $0x68] sm:$0xff] %v2182_v55  ;;  %v1933_v17 = vmul.f32 %v2481_v46, %v2921_v52  ;;  %v2993_v55 = vld [vmem:[#allocation6 + $0xc0] sm:$0xff] }
  0x94   :  { %v1259_v48 = vadd.f32 %v1127_v19, %v951_v32  ;;  %v1743_v33 = vrot.slane %v1625_v6, 2  ;;  %v115_v40 = vmul.f32 %v2423_v5, %v2734_v25  ;;  %v1567_v44 = vadd.f32 %v1432_v47, %v1258_v27 }
  0x95   :  { %v1436_v26 = vsel %vm1408_vm1, %v1434_v20, %v1435_v38  ;;  %v2050_v30 = vrot.slane %v1932_v21, 2  ;;  %v171_v37 = vmul.f32 %v2429_v8, %v2825_v16  ;;  %v2051_v49 = vrot.slane %v1933_v17, 2 }
  0x96   :  { %v1568_v3 = vadd.f32 %v1436_v26, %v1259_v48  ;;  %v1744_v2 = vsel %vm1408_vm1, %v1742_v57, %v1743_v33  ;;  %v281_v51 = vmul.f32 %v2439_v12, %v2921_v52  ;;  %v1875_v63 = vadd.f32 %v1740_v59, %v1567_v44 }
  0x97   :  { %v225_v25 = vadd.f32 %v171_v37, %v115_v40  ;;  %v392_v47 = vmul.f32 %v2441_v13, %v2763_v54  ;;  %v701_v35 = vmul.f32 %v2451_v18, %v2855_v60  ;;  %v2052_v24 = vsel %vm1408_vm1, %v2050_v30, %v2051_v49 }
  0x98   :  { %v1876_v15 = vadd.f32 %v1744_v2, %v1568_v3  ;;  %v2961_v45 = vmul.f32 %v2459_v23, %v2952_v56  ;;  %v2965_v22 = vmul.f32 %v2466_v31, %v2763_v54  ;;  %v2183_v59 = vadd.f32 %v2048_v34, %v1875_v63  ;;  %v3020_v2 = vld [vmem:[#allocation6 + $0xc8] sm:$0xff] }
  0x99   :  { %v335_v61 = vadd.f32 %v281_v51, %v225_v25  ;;  %v512_v62 = vrot.slane %v392_v47, 1  ;;  %v820_v28 = vrot.slane %v701_v35, 1  ;;  %v2973_v43 = vmul.f32 %v2473_v39, %v2855_v60 }
  0x9a   :  { %v2184_v9 = vadd.f32 %v2052_v24, %v1876_v15  ;;  %v1128_v41 = vrot.slane %v2961_v45, 1  ;;  %v1437_v58 = vrot.slane %v2965_v22, 2  ;;  %2237 = vst [vmem:[#allocation7 + $0x70] sm:$0x3] %v2183_v59  ;;  %v2979_v14 = vmul.f32 %v2481_v46, %v2952_v56 }
  0x9b   :  { %v513_v4 = vsel %vm483_vm0, %v510_v36, %v512_v62  ;;  %v821_v0 = vsel %vm483_vm0, %v818_v1, %v820_v28  ;;  %v116_v34 = vmul.f32 %v2423_v5, %v2763_v54  ;;  %v1745_v20 = vrot.slane %v2973_v43, 2 }
  0x9c   :  { %2238 = vst [vmem:[#allocation7 + $0x78] sm:$0xff] %v2184_v9  ;;  %v644_v50 = vadd.f32 %v513_v4, %v335_v61  ;;  %v1129_v53 = vsel %vm483_vm0, %v1126_v10, %v1128_v41  ;;  %v1438_v7 = vsel %vm1408_vm1, %v1435_v38, %v1437_v58  ;;  %v2053_v36 = vrot.slane %v2979_v14, 2 }
  0x9d   :  { %v172_v1 = vmul.f32 %v2429_v8, %v2855_v60  ;;  %v282_v29 = vmul.f32 %v2439_v12, %v2952_v56  ;;  %v117_v54 = vmul.f32 %v2423_v5, %v2800_v42  ;;  %v1746_v32 = vsel %vm1408_vm1, %v1743_v33, %v1745_v20 }
  0x9e   :  { %v952_v10 = vadd.f32 %v821_v0, %v644_v50  ;;  %v173_v19 = vmul.f32 %v2429_v8, %v2896_v11  ;;  %v283_v6 = vmul.f32 %v2439_v12, %v2993_v55  ;;  %v2054_v27 = vsel %vm1408_vm1, %v2051_v49, %v2053_v36 }
  0x9f   :  { %v226_v38 = vadd.f32 %v172_v1, %v116_v34  ;;  %v393_v57 = vmul.f32 %v2441_v13, %v2800_v42  ;;  %v3009_v21 = vmul.f32 %v2441_v13, %v2825_v16  ;;  %v702_v17 = vmul.f32 %v2451_v18, %v2896_v11 }
  0xa0   :  { %v1260_v48 = vadd.f32 %v1129_v53, %v952_v10  ;;  %v227_v33 = vadd.f32 %v173_v19, %v117_v54  ;;  %v3015_v40 = vmul.f32 %v2451_v18, %v2921_v52  ;;  %v1010_v37 = vmul.f32 %v2459_v23, %v2993_v55 }
  0xa1   :  { %v336_v44 = vadd.f32 %v282_v29, %v226_v38  ;;  %v514_v26 = vrot.slane %v393_v57, 1  ;;  %v515_v30 = vrot.slane %v3009_v21, 1  ;;  %v822_v51 = vrot.slane %v702_v17, 1  ;;  %v3048_v17 = vld [vmem:[#allocation6 + $0xd0] sm:$0xf] }
  0xa2   :  { %v1569_v3 = vadd.f32 %v1438_v7, %v1260_v48  ;;  %v337_v49 = vadd.f32 %v283_v6, %v227_v33  ;;  %v823_v63 = vrot.slane %v3015_v40, 1  ;;  %v1011_v35 = vmul.f32 %v2459_v23, %v3020_v2 }
  0xa3   :  { %v645_v25 = vadd.f32 %v512_v62, %v336_v44  ;;  %v516_v47 = vsel %vm483_vm0, %v514_v26, %v515_v30  ;;  %v1130_v15 = vrot.slane %v1010_v37, 1  ;;  %v1318_v61 = vmul.f32 %v2466_v31, %v2800_v42 }
  0xa4   :  { %v1877_v24 = vadd.f32 %v1746_v32, %v1569_v3  ;;  %v646_v45 = vadd.f32 %v516_v47, %v337_v49  ;;  %v824_v59 = vsel %vm483_vm0, %v822_v51, %v823_v63  ;;  %v1131_v43 = vrot.slane %v1011_v35, 1 }
  0xa5   :  { %v953_v9 = vadd.f32 %v820_v28, %v645_v25  ;;  %v1319_v4 = vmul.f32 %v2466_v31, %v2825_v16  ;;  %v1627_v62 = vmul.f32 %v2473_v39, %v2896_v11  ;;  %v1439_v50 = vrot.slane %v1318_v61, 2 }
  0xa6   :  { %v2185_v0 = vadd.f32 %v2054_v27, %v1877_v24  ;;  %v954_v34 = vadd.f32 %v824_v59, %v646_v45  ;;  %v1628_v53 = vmul.f32 %v2473_v39, %v2921_v52  ;;  %v1132_v1 = vsel %vm483_vm0, %v1130_v15, %v1131_v43 }
  0xa7   :  { %v1261_v7 = vadd.f32 %v1128_v41, %v953_v9  ;;  %v1440_v29 = vrot.slane %v1319_v4, 2  ;;  %v1747_v54 = vrot.slane %v1627_v62, 2  ;;  %v1935_v10 = vmul.f32 %v2481_v46, %v2993_v55 }
  0xa8   :  { %2239 = vst [vmem:[#allocation7 + $0x80] sm:$0xff] %v2185_v0  ;;  %v1262_v42 = vadd.f32 %v1132_v1, %v954_v34  ;;  %v1748_v28 = vrot.slane %v1628_v53, 2  ;;  %v1936_v32 = vmul.f32 %v2481_v46, %v3020_v2  ;;  %v118_v41 = vmul.f32 %v2423_v5, %v2825_v16  ;;  %v3087_v53 = vld [vmem:[#allocation6 + $0xd8] sm:$0xff] }
  0xa9   :  { %v1570_v19 = vadd.f32 %v1437_v58, %v1261_v7  ;;  %v1441_v6 = vsel %vm1408_vm1, %v1439_v50, %v1440_v29  ;;  %v174_v27 = vmul.f32 %v2429_v8, %v2921_v52  ;;  %v2055_v21 = vrot.slane %v1935_v10, 2 }
  0xaa   :  { %v1571_v38 = vadd.f32 %v1441_v6, %v1262_v42  ;;  %v1749_v57 = vsel %vm1408_vm1, %v1747_v54, %v1748_v28  ;;  %v2056_v48 = vrot.slane %v1936_v32, 2  ;;  %v284_v22 = vmul.f32 %v2439_v12, %v3020_v2 }
  0xab   :  { %v1878_v33 = vadd.f32 %v1745_v20, %v1570_v19  ;;  %v228_v40 = vadd.f32 %v174_v27, %v118_v41  ;;  %v395_v58 = vmul.f32 %v2441_v13, %v2855_v60  ;;  %v704_v26 = vmul.f32 %v2451_v18, %v2952_v56 }
  0xac   :  { %v1879_v44 = vadd.f32 %v1749_v57, %v1571_v38  ;;  %v2057_v16 = vsel %vm1408_vm1, %v2055_v21, %v2056_v48  ;;  %v1012_v37 = vmul.f32 %v2459_v23, %v3048_v17  ;;  %v3063_v51 = vmul.f32 %v2466_v31, %v2855_v60  ;;  %v3112_v57 = vld [vmem:[#allocation6 + $0xe0] sm:$0xff] }
  0xad   :  { %v2186_v20 = vadd.f32 %v2053_v36, %v1878_v33  ;;  %v338_v3 = vadd.f32 %v284_v22, %v228_v40  ;;  %v517_v49 = vrot.slane %v395_v58, 1  ;;  %v825_v47 = vrot.slane %v704_v26, 1 }
  0xae   :  { %v2187_v25 = vadd.f32 %v2057_v16, %v1879_v44  ;;  %v1133_v35 = vrot.slane %v1012_v37, 1  ;;  %v3067_v15 = vmul.f32 %v2473_v39, %v2952_v56  ;;  %v1442_v45 = vrot.slane %v3063_v51, 2 }
  0xaf   :  { %2240 = vst [vmem:[#allocation7 + $0x88] sm:$0x3] %v2186_v20  ;;  %v518_v24 = vsel %vm483_vm0, %v515_v30, %v517_v49  ;;  %v3073_v14 = vmul.f32 %v2481_v46, %v3048_v17  ;;  %v119_v36 = vmul.f32 %v2423_v5, %v2855_v60  ;;  %v826_v61 = vsel %vm483_vm0, %v823_v63, %v825_v47 }
  0xb0   :  { %2241 = vst [vmem:[#allocation7 + $0x90] sm:$0xff] %v2187_v25  ;;  %v647_v59 = vadd.f32 %v518_v24, %v338_v3  ;;  %v1134_v9 = vsel %vm483_vm0, %v1131_v43, %v1133_v35  ;;  %v1750_v4 = vrot.slane %v3067_v15, 2  ;;  %v1443_v62 = vsel %vm1408_vm1, %v1440_v29, %v1442_v45 }
  0xb1   :  { %v2058_v30 = vrot.slane %v3073_v14, 2  ;;  %v175_v0 = vmul.f32 %v2429_v8, %v2952_v56  ;;  %v285_v34 = vmul.f32 %v2439_v12, %v3048_v17  ;;  %v120_v63 = vmul.f32 %v2423_v5, %v2896_v11 }
  0xb2   :  { %v955_v50 = vadd.f32 %v826_v61, %v647_v59  ;;  %v1751_v60 = vsel %vm1408_vm1, %v1748_v28, %v1750_v4  ;;  %v176_v43 = vmul.f32 %v2429_v8, %v2993_v55  ;;  %v286_v29 = vmul.f32 %v2439_v12, %v3087_v53 }
  0xb3   :  { %v2059_v7 = vsel %vm1408_vm1, %v2056_v48, %v2058_v30  ;;  %v229_v1 = vadd.f32 %v175_v0, %v119_v36  ;;  %v396_v54 = vmul.f32 %v2441_v13, %v2896_v11  ;;  %v3102_v10 = vmul.f32 %v2441_v13, %v2921_v52 }
  0xb4   :  { %v1263_v42 = vadd.f32 %v1134_v9, %v955_v50  ;;  %v230_v28 = vadd.f32 %v176_v43, %v120_v63  ;;  %v705_v32 = vmul.f32 %v2451_v18, %v2993_v55  ;;  %v3108_v41 = vmul.f32 %v2451_v18, %v3020_v2 }
  0xb5   :  { %v339_v19 = vadd.f32 %v285_v34, %v229_v1  ;;  %v519_v6 = vrot.slane %v396_v54, 1  ;;  %v1013_v27 = vmul.f32 %v2459_v23, %v3087_v53  ;;  %v520_v48 = vrot.slane %v3102_v10, 1 }
  0xb6   :  { %v1572_v38 = vadd.f32 %v1443_v62, %v1263_v42  ;;  %v340_v21 = vadd.f32 %v286_v29, %v230_v28  ;;  %v827_v33 = vrot.slane %v705_v32, 1  ;;  %v828_v22 = vrot.slane %v3108_v41, 1  ;;  %v3141_v32 = vld [vmem:[#allocation6 + $0xe8] sm:$0xf] }
  0xb7   :  { %v648_v40 = vadd.f32 %v517_v49, %v339_v19  ;;  %v1014_v58 = vmul.f32 %v2459_v23, %v3112_v57  ;;  %v1135_v44 = vrot.slane %v1013_v27, 1  ;;  %v521_v26 = vsel %vm483_vm0, %v519_v6, %v520_v48 }
  0xb8   :  { %v1880_v16 = vadd.f32 %v1751_v60, %v1572_v38  ;;  %v1321_v37 = vmul.f32 %v2466_v31, %v2896_v11  ;;  %v1322_v20 = vmul.f32 %v2466_v31, %v2921_v52  ;;  %v649_v51 = vadd.f32 %v521_v26, %v340_v21 }
  0xb9   :  { %v956_v3 = vadd.f32 %v825_v47, %v648_v40  ;;  %v829_v25 = vsel %vm483_vm0, %v827_v33, %v828_v22  ;;  %v1136_v49 = vrot.slane %v1014_v58, 1  ;;  %v1630_v59 = vmul.f32 %v2473_v39, %v2993_v55 }
  0xba   :  { %v2188_v15 = vadd.f32 %v2059_v7, %v1880_v16  ;;  %v1444_v24 = vrot.slane %v1321_v37, 2  ;;  %v1445_v36 = vrot.slane %v1322_v20, 2  ;;  %v957_v9 = vadd.f32 %v829_v25, %v649_v51 }
  0xbb   :  { %v1264_v61 = vadd.f32 %v1133_v35, %v956_v3  ;;  %v1137_v62 = vsel %vm483_vm0, %v1135_v44, %v1136_v49  ;;  %v1631_v11 = vmul.f32 %v2473_v39, %v3020_v2  ;;  %v1752_v0 = vrot.slane %v1630_v59, 2 }
  0xbc   :  { %2242 = vst [vmem:[#allocation7 + $0x98] sm:$0xff] %v2188_v15  ;;  %v1446_v47 = vsel %vm1408_vm1, %v1444_v24, %v1445_v36  ;;  %v1938_v34 = vmul.f32 %v2481_v46, %v3087_v53  ;;  %v1939_v50 = vmul.f32 %v2481_v46, %v3112_v57  ;;  %v1265_v63 = vadd.f32 %v1137_v62, %v957_v9 }
  0xbd   :  { %v1573_v60 = vadd.f32 %v1442_v45, %v1264_v61  ;;  %v1753_v43 = vrot.slane %v1631_v11, 2  ;;  %v121_v35 = vmul.f32 %v2423_v5, %v2921_v52  ;;  %v177_v29 = vmul.f32 %v2429_v8, %v3020_v2 }
  0xbe   :  { %v2060_v7 = vrot.slane %v1938_v34, 2  ;;  %v2061_v1 = vrot.slane %v1939_v50, 2  ;;  %v287_v54 = vmul.f32 %v2439_v12, %v3112_v57  ;;  %v1574_v28 = vadd.f32 %v1446_v47, %v1265_v63 }
  0xbf   :  { %v1881_v42 = vadd.f32 %v1750_v4, %v1573_v60  ;;  %v1754_v10 = vsel %vm1408_vm1, %v1752_v0, %v1753_v43  ;;  %v398_v45 = vmul.f32 %v2441_v13, %v2952_v56  ;;  %v231_v52 = vadd.f32 %v177_v29, %v121_v35 }
  0xc0   :  { %v2062_v19 = vsel %vm1408_vm1, %v2060_v7, %v2061_v1  ;;  %v707_v6 = vmul.f32 %v2451_v18, %v3048_v17  ;;  %v1015_v41 = vmul.f32 %v2459_v23, %v3141_v32  ;;  %v1882_v27 = vadd.f32 %v1754_v10, %v1574_v28 }
  0xc1   :  { %v2189_v4 = vadd.f32 %v2058_v30, %v1881_v42  ;;  %v522_v38 = vrot.slane %v398_v45, 1  ;;  %v3154_v21 = vmul.f32 %v2466_v31, %v2952_v56  ;;  %v341_v33 = vadd.f32 %v287_v54, %v231_v52 }
  0xc2   :  { %v830_v40 = vrot.slane %v707_v6, 1  ;;  %v1138_v58 = vrot.slane %v1015_v41, 1  ;;  %v3158_v44 = vmul.f32 %v2473_v39, %v3048_v17  ;;  %v2190_v16 = vadd.f32 %v2062_v19, %v1882_v27 }
  0xc3   :  { %2243 = vst [vmem:[#allocation7 + $0xa0] sm:$0x3] %v2189_v4  ;;  %v523_v26 = vsel %vm483_vm0, %v520_v48, %v522_v38  ;;  %v1447_v14 = vrot.slane %v3154_v21, 2  ;;  %v3164_v30 = vmul.f32 %v2481_v46, %v3141_v32  ;;  %v122_v48 = vmul.f32 %v2423_v5, %v2952_v56 }
  0xc4   :  { %v650_v37 = vadd.f32 %v523_v26, %v341_v33  ;;  %v831_v20 = vsel %vm483_vm0, %v828_v22, %v830_v40  ;;  %v1139_v3 = vsel %vm483_vm0, %v1136_v49, %v1138_v58  ;;  %v1755_v51 = vrot.slane %v3158_v44, 2  ;;  %2244 = vst [vmem:[#allocation7 + $0xa8] sm:$0xff] %v2190_v16  ;;  %v3178_v49 = vld [vmem:[#allocation6 + $0xf0] sm:$0xff] }
  0xc5   :  { %v1448_v25 = vsel %vm1408_vm1, %v1445_v36, %v1447_v14  ;;  %v2063_v15 = vrot.slane %v3164_v30, 2  ;;  %v178_v24 = vmul.f32 %v2429_v8, %v3048_v17  ;;  %v288_v22 = vmul.f32 %v2439_v12, %v3141_v32 }
  0xc6   :  { %v958_v59 = vadd.f32 %v831_v20, %v650_v37  ;;  %v1756_v61 = vsel %vm1408_vm1, %v1753_v43, %v1755_v51  ;;  %v123_v9 = vmul.f32 %v2423_v5, %v2993_v55  ;;  %v179_v56 = vmul.f32 %v2429_v8, %v3087_v53 }
  0xc7   :  { %v2064_v36 = vsel %vm1408_vm1, %v2061_v1, %v2063_v15  ;;  %v232_v62 = vadd.f32 %v178_v24, %v122_v48  ;;  %v289_v11 = vmul.f32 %v2439_v12, %v3178_v49  ;;  %v399_v0 = vmul.f32 %v2441_v13, %v2993_v55  ;;  %v3203_v1 = vld [vmem:[#allocation6 + $0xf8] sm:$0xff] }
  0xc8   :  { %v1266_v47 = vadd.f32 %v1139_v3, %v958_v59  ;;  %v3193_v34 = vmul.f32 %v2441_v13, %v3020_v2  ;;  %v708_v50 = vmul.f32 %v2451_v18, %v3087_v53  ;;  %v233_v63 = vadd.f32 %v179_v56, %v123_v9 }
  0xc9   :  { %v342_v60 = vadd.f32 %v288_v22, %v232_v62  ;;  %v3199_v43 = vmul.f32 %v2451_v18, %v3112_v57  ;;  %v1016_v35 = vmul.f32 %v2459_v23, %v3178_v49  ;;  %v524_v29 = vrot.slane %v399_v0, 1 }
  0xca   :  { %v1575_v7 = vadd.f32 %v1448_v25, %v1266_v47  ;;  %v525_v54 = vrot.slane %v3193_v34, 1  ;;  %v832_v42 = vrot.slane %v708_v50, 1  ;;  %v343_v10 = vadd.f32 %v289_v11, %v233_v63 }
  0xcb   :  { %v651_v28 = vadd.f32 %v522_v38, %v342_v60  ;;  %v833_v45 = vrot.slane %v3199_v43, 1  ;;  %v1017_v19 = vmul.f32 %v2459_v23, %v3203_v1  ;;  %v1140_v41 = vrot.slane %v1016_v35, 1  ;;  %v3233_v60 = vld [vmem:[#allocation6 + $0x100] sm:$0xf] }
  0xcc   :  { %v1883_v52 = vadd.f32 %v1756_v61, %v1575_v7  ;;  %v526_v6 = vsel %vm483_vm0, %v524_v29, %v525_v54  ;;  %v1324_v4 = vmul.f32 %v2466_v31, %v2993_v55  ;;  %v1325_v38 = vmul.f32 %v2466_v31, %v3020_v2 }
  0xcd   :  { %v959_v27 = vadd.f32 %v830_v40, %v651_v28  ;;  %v652_v21 = vadd.f32 %v526_v6, %v343_v10  ;;  %v834_v33 = vsel %vm483_vm0, %v832_v42, %v833_v45  ;;  %v1141_v44 = vrot.slane %v1017_v19, 1 }
  0xce   :  { %v2191_v16 = vadd.f32 %v2064_v36, %v1883_v52  ;;  %v1449_v26 = vrot.slane %v1324_v4, 2  ;;  %v1633_v37 = vmul.f32 %v2473_v39, %v3087_v53  ;;  %v1634_v55 = vmul.f32 %v2473_v39, %v3112_v57 }
  0xcf   :  { %v1267_v20 = vadd.f32 %v1138_v58, %v959_v27  ;;  %v960_v3 = vadd.f32 %v834_v33, %v652_v21  ;;  %v1142_v25 = vsel %vm483_vm0, %v1140_v41, %v1141_v44  ;;  %v1450_v40 = vrot.slane %v1325_v38, 2 }
  0xd0   :  { %2245 = vst [vmem:[#allocation7 + $0xb0] sm:$0xff] %v2191_v16  ;;  %v1757_v48 = vrot.slane %v1633_v37, 2  ;;  %v1941_v24 = vmul.f32 %v2481_v46, %v3178_v49  ;;  %v1942_v59 = vmul.f32 %v2481_v46, %v3203_v1  ;;  %v1758_v9 = vrot.slane %v1634_v55, 2 }
  0xd1   :  { %v1576_v61 = vadd.f32 %v1447_v14, %v1267_v20  ;;  %v1268_v22 = vadd.f32 %v1142_v25, %v960_v3  ;;  %v124_v58 = vmul.f32 %v2423_v5, %v3020_v2  ;;  %v1451_v36 = vsel %vm1408_vm1, %v1449_v26, %v1450_v40  ;;  %v3274_v20 = vld [vmem:[#allocation6 + $0x108] sm:$0xff] }
  0xd2   :  { %v2065_v62 = vrot.slane %v1941_v24, 2  ;;  %v2066_v56 = vrot.slane %v1942_v59, 2  ;;  %v180_v11 = vmul.f32 %v2429_v8, %v3112_v57  ;;  %v1759_v34 = vsel %vm1408_vm1, %v1757_v48, %v1758_v9 }
  0xd3   :  { %v1884_v47 = vadd.f32 %v1755_v51, %v1576_v61  ;;  %v1577_v0 = vadd.f32 %v1451_v36, %v1268_v22  ;;  %v290_v50 = vmul.f32 %v2439_v12, %v3203_v1  ;;  %v401_v2 = vmul.f32 %v2441_v13, %v3048_v17 }
  0xd4   :  { %v2067_v14 = vsel %vm1408_vm1, %v2065_v62, %v2066_v56  ;;  %v234_v63 = vadd.f32 %v180_v11, %v124_v58  ;;  %v710_v43 = vmul.f32 %v2451_v18, %v3141_v32  ;;  %v3243_v7 = vmul.f32 %v2459_v23, %v3233_v60  ;;  %v3299_v62 = vld [vmem:[#allocation6 + $0x110] sm:$0xff] }
  0xd5   :  { %v2192_v51 = vadd.f32 %v2063_v15, %v1884_v47  ;;  %v1885_v35 = vadd.f32 %v1759_v34, %v1577_v0  ;;  %v3247_v29 = vmul.f32 %v2466_v31, %v3048_v17  ;;  %v527_v28 = vrot.slane %v401_v2, 1 }
  0xd6   :  { %v344_v42 = vadd.f32 %v290_v50, %v234_v63  ;;  %v835_v10 = vrot.slane %v710_v43, 1  ;;  %v3251_v19 = vmul.f32 %v2473_v39, %v3141_v32  ;;  %v1143_v30 = vrot.slane %v3243_v7, 1 }
  0xd7   :  { %2246 = vst [vmem:[#allocation7 + $0xb8] sm:$0x3] %v2192_v51  ;;  %v2193_v52 = vadd.f32 %v2067_v14, %v1885_v35  ;;  %v1452_v15 = vrot.slane %v3247_v29, 2  ;;  %v3257_v6 = vmul.f32 %v2481_v46, %v3233_v60  ;;  %v528_v41 = vsel %vm483_vm0, %v525_v54, %v527_v28 }
  0xd8   :  { %v836_v4 = vsel %vm483_vm0, %v833_v45, %v835_v10  ;;  %v1760_v27 = vrot.slane %v3251_v19, 2  ;;  %v125_v21 = vmul.f32 %v2423_v5, %v3048_v17  ;;  %v653_v33 = vadd.f32 %v528_v41, %v344_v42 }
  0xd9   :  { %2247 = vst [vmem:[#allocation7 + $0xc0] sm:$0xff] %v2193_v52  ;;  %v1144_v16 = vsel %vm483_vm0, %v1141_v44, %v1143_v30  ;;  %v1453_v38 = vsel %vm1408_vm1, %v1450_v40, %v1452_v15  ;;  %v2068_v26 = vrot.slane %v3257_v6, 2  ;;  %v181_v54 = vmul.f32 %v2429_v8, %v3141_v32 }
  0xda   :  { %v1761_v37 = vsel %vm1408_vm1, %v1758_v9, %v1760_v27  ;;  %v291_v45 = vmul.f32 %v2439_v12, %v3233_v60  ;;  %v126_v17 = vmul.f32 %v2423_v5, %v3087_v53  ;;  %v961_v44 = vadd.f32 %v836_v4, %v653_v33 }
  0xdb   :  { %v2069_v3 = vsel %vm1408_vm1, %v2066_v56, %v2068_v26  ;;  %v182_v25 = vmul.f32 %v2429_v8, %v3178_v49  ;;  %v292_v55 = vmul.f32 %v2439_v12, %v3274_v20  ;;  %v235_v40 = vadd.f32 %v181_v54, %v125_v21 }
  0xdc   :  { %v402_v48 = vmul.f32 %v2441_v13, %v3087_v53  ;;  %v3289_v24 = vmul.f32 %v2441_v13, %v3112_v57  ;;  %v711_v59 = vmul.f32 %v2451_v18, %v3178_v49  ;;  %v1269_v61 = vadd.f32 %v1144_v16, %v961_v44 }
  0xdd   :  { %v236_v22 = vadd.f32 %v182_v25, %v126_v17  ;;  %v3295_v9 = vmul.f32 %v2451_v18, %v3203_v1  ;;  %v1019_v58 = vmul.f32 %v2459_v23, %v3274_v20  ;;  %v345_v36 = vadd.f32 %v291_v45, %v235_v40 }
  0xde   :  { %v529_v56 = vrot.slane %v402_v48, 1  ;;  %v530_v11 = vrot.slane %v3289_v24, 1  ;;  %v837_v47 = vrot.slane %v711_v59, 1  ;;  %v1578_v0 = vadd.f32 %v1453_v38, %v1269_v61 }
  0xdf   :  { %v346_v34 = vadd.f32 %v292_v55, %v236_v22  ;;  %v838_v50 = vrot.slane %v3295_v9, 1  ;;  %v1020_v14 = vmul.f32 %v2459_v23, %v3299_v62  ;;  %v654_v63 = vadd.f32 %v527_v28, %v345_v36  ;;  %v3330_v9 = vld [vmem:[#allocation6 + $0x118] sm:$0xf] }
  0xe0   :  { %v531_v2 = vsel %vm483_vm0, %v529_v56, %v530_v11  ;;  %v1145_v43 = vrot.slane %v1019_v58, 1  ;;  %v1327_v51 = vmul.f32 %v2466_v31, %v3087_v53  ;;  %v1886_v35 = vadd.f32 %v1761_v37, %v1578_v0 }
  0xe1   :  { %v655_v7 = vadd.f32 %v531_v2, %v346_v34  ;;  %v839_v29 = vsel %vm483_vm0, %v837_v47, %v838_v50  ;;  %v1146_v42 = vrot.slane %v1020_v14, 1  ;;  %v962_v52 = vadd.f32 %v835_v10, %v654_v63 }
  0xe2   :  { %v1328_v41 = vmul.f32 %v2466_v31, %v3112_v57  ;;  %v1454_v4 = vrot.slane %v1327_v51, 2  ;;  %v1636_v21 = vmul.f32 %v2473_v39, %v3178_v49  ;;  %v2194_v28 = vadd.f32 %v2069_v3, %v1886_v35 }
  0xe3   :  { %v963_v33 = vadd.f32 %v839_v29, %v655_v7  ;;  %v1147_v16 = vsel %vm483_vm0, %v1145_v43, %v1146_v42  ;;  %v1637_v53 = vmul.f32 %v2473_v39, %v3203_v1  ;;  %v1270_v38 = vadd.f32 %v1143_v30, %v962_v52 }
  0xe4   :  { %v1455_v37 = vrot.slane %v1328_v41, 2  ;;  %v1762_v54 = vrot.slane %v1636_v21, 2  ;;  %v1944_v10 = vmul.f32 %v2481_v46, %v3274_v20  ;;  %2248 = vst [vmem:[#allocation7 + $0xc8] sm:$0xff] %v2194_v28  ;;  %v1945_v44 = vmul.f32 %v2481_v46, %v3299_v62  ;;  %v3371_v28 = vld [vmem:[#allocation6 + $0x120] sm:$0xff] }
  0xe5   :  { %v1271_v45 = vadd.f32 %v1147_v16, %v963_v33  ;;  %v1763_v17 = vrot.slane %v1637_v53, 2  ;;  %v127_v3 = vmul.f32 %v2423_v5, %v3112_v57  ;;  %v1579_v25 = vadd.f32 %v1452_v15, %v1270_v38 }
  0xe6   :  { %v1456_v55 = vsel %vm1408_vm1, %v1454_v4, %v1455_v37  ;;  %v2070_v40 = vrot.slane %v1944_v10, 2  ;;  %v183_v30 = vmul.f32 %v2429_v8, %v3203_v1  ;;  %v2071_v59 = vrot.slane %v1945_v44, 2 }
  0xe7   :  { %v1580_v48 = vadd.f32 %v1456_v55, %v1271_v45  ;;  %v1764_v24 = vsel %vm1408_vm1, %v1762_v54, %v1763_v17  ;;  %v293_v61 = vmul.f32 %v2439_v12, %v3299_v62  ;;  %v1887_v22 = vadd.f32 %v1760_v27, %v1579_v25 }
  0xe8   :  { %v237_v57 = vadd.f32 %v183_v30, %v127_v3  ;;  %v404_v15 = vmul.f32 %v2441_v13, %v3141_v32  ;;  %v713_v58 = vmul.f32 %v2451_v18, %v3233_v60  ;;  %v2072_v56 = vsel %vm1408_vm1, %v2070_v40, %v2071_v59 }
  0xe9   :  { %v1888_v36 = vadd.f32 %v1764_v24, %v1580_v48  ;;  %v3339_v47 = vmul.f32 %v2459_v23, %v3330_v9  ;;  %v3343_v19 = vmul.f32 %v2466_v31, %v3141_v32  ;;  %v2195_v27 = vadd.f32 %v2068_v26, %v1887_v22  ;;  %v3398_v24 = vld [vmem:[#allocation6 + $0x128] sm:$0xff] }
  0xea   :  { %v347_v0 = vadd.f32 %v293_v61, %v237_v57  ;;  %v532_v34 = vrot.slane %v404_v15, 1  ;;  %v840_v14 = vrot.slane %v713_v58, 1  ;;  %v3351_v51 = vmul.f32 %v2473_v39, %v3233_v60 }
  0xeb   :  { %v2196_v63 = vadd.f32 %v2072_v56, %v1888_v36  ;;  %v1148_v2 = vrot.slane %v3339_v47, 1  ;;  %v1457_v43 = vrot.slane %v3343_v19, 2  ;;  %2249 = vst [vmem:[#allocation7 + $0xd0] sm:$0x3] %v2195_v27  ;;  %v3357_v6 = vmul.f32 %v2481_v46, %v3330_v9 }
  0xec   :  { %v533_v35 = vsel %vm483_vm0, %v530_v11, %v532_v34  ;;  %v841_v7 = vsel %vm483_vm0, %v838_v50, %v840_v14  ;;  %v128_v26 = vmul.f32 %v2423_v5, %v3141_v32  ;;  %v1765_v4 = vrot.slane %v3351_v51, 2 }
  0xed   :  { %2250 = vst [vmem:[#allocation7 + $0xd8] sm:$0xff] %v2196_v63  ;;  %v656_v29 = vadd.f32 %v533_v35, %v347_v0  ;;  %v1149_v52 = vsel %vm483_vm0, %v1146_v42, %v1148_v2  ;;  %v1458_v41 = vsel %vm1408_vm1, %v1455_v37, %v1457_v43  ;;  %v2073_v11 = vrot.slane %v3357_v6, 2 }
  0xee   :  { %v184_v50 = vmul.f32 %v2429_v8, %v3233_v60  ;;  %v294_v21 = vmul.f32 %v2439_v12, %v3330_v9  ;;  %v129_v32 = vmul.f32 %v2423_v5, %v3178_v49  ;;  %v1766_v33 = vsel %vm1408_vm1, %v1763_v17, %v1765_v4 }
  0xef   :  { %v964_v42 = vadd.f32 %v841_v7, %v656_v29  ;;  %v185_v16 = vmul.f32 %v2429_v8, %v3274_v20  ;;  %v295_v53 = vmul.f32 %v2439_v12, %v3371_v28  ;;  %v2074_v38 = vsel %vm1408_vm1, %v2071_v59, %v2073_v11 }
  0xf0   :  { %v238_v37 = vadd.f32 %v184_v50, %v128_v26  ;;  %v405_v54 = vmul.f32 %v2441_v13, %v3178_v49  ;;  %v3387_v10 = vmul.f32 %v2441_v13, %v3203_v1  ;;  %v714_v44 = vmul.f32 %v2451_v18, %v3274_v20 }
  0xf1   :  { %v1272_v45 = vadd.f32 %v1149_v52, %v964_v42  ;;  %v239_v17 = vadd.f32 %v185_v16, %v129_v32  ;;  %v3393_v3 = vmul.f32 %v2451_v18, %v3299_v62  ;;  %v1022_v30 = vmul.f32 %v2459_v23, %v3371_v28 }
  0xf2   :  { %v348_v25 = vadd.f32 %v294_v21, %v238_v37  ;;  %v534_v55 = vrot.slane %v405_v54, 1  ;;  %v535_v40 = vrot.slane %v3387_v10, 1  ;;  %v842_v61 = vrot.slane %v714_v44, 1  ;;  %v3426_v44 = vld [vmem:[#allocation6 + $0x130] sm:$0xf] }
  0xf3   :  { %v1581_v48 = vadd.f32 %v1458_v41, %v1272_v45  ;;  %v349_v59 = vadd.f32 %v295_v53, %v239_v17  ;;  %v843_v22 = vrot.slane %v3393_v3, 1  ;;  %v1023_v58 = vmul.f32 %v2459_v23, %v3398_v24 }
  0xf4   :  { %v657_v57 = vadd.f32 %v532_v34, %v348_v25  ;;  %v536_v15 = vsel %vm483_vm0, %v534_v55, %v535_v40  ;;  %v1150_v36 = vrot.slane %v1022_v30, 1  ;;  %v1330_v0 = vmul.f32 %v2466_v31, %v3178_v49 }
  0xf5   :  { %v1889_v56 = vadd.f32 %v1766_v33, %v1581_v48  ;;  %v658_v47 = vadd.f32 %v536_v15, %v349_v59  ;;  %v844_v27 = vsel %vm483_vm0, %v842_v61, %v843_v22  ;;  %v1151_v51 = vrot.slane %v1023_v58, 1 }
  0xf6   :  { %v965_v63 = vadd.f32 %v840_v14, %v657_v57  ;;  %v1331_v35 = vmul.f32 %v2466_v31, %v3203_v1  ;;  %v1639_v34 = vmul.f32 %v2473_v39, %v3274_v20  ;;  %v1459_v29 = vrot.slane %v1330_v0, 2 }
  0xf7   :  { %v2197_v7 = vadd.f32 %v2074_v38, %v1889_v56  ;;  %v966_v26 = vadd.f32 %v844_v27, %v658_v47  ;;  %v1640_v52 = vmul.f32 %v2473_v39, %v3299_v62  ;;  %v1152_v50 = vsel %vm483_vm0, %v1150_v36, %v1151_v51 }
  0xf8   :  { %v1273_v41 = vadd.f32 %v1148_v2, %v965_v63  ;;  %v1460_v21 = vrot.slane %v1331_v35, 2  ;;  %v1767_v32 = vrot.slane %v1639_v34, 2  ;;  %v1947_v42 = vmul.f32 %v2481_v46, %v3371_v28 }
  0xf9   :  { %2251 = vst [vmem:[#allocation7 + $0xe0] sm:$0xff] %v2197_v7  ;;  %v1274_v49 = vadd.f32 %v1152_v50, %v966_v26  ;;  %v1768_v14 = vrot.slane %v1640_v52, 2  ;;  %v1948_v33 = vmul.f32 %v2481_v46, %v3398_v24  ;;  %v130_v2 = vmul.f32 %v2423_v5, %v3203_v1  ;;  %v3465_v52 = vld [vmem:[#allocation6 + $0x138] sm:$0xff] }
  0xfa   :  { %v1582_v16 = vadd.f32 %v1457_v43, %v1273_v41  ;;  %v1461_v53 = vsel %vm1408_vm1, %v1459_v29, %v1460_v21  ;;  %v186_v38 = vmul.f32 %v2429_v8, %v3299_v62  ;;  %v2075_v10 = vrot.slane %v1947_v42, 2 }
  0xfb   :  { %v1583_v37 = vadd.f32 %v1461_v53, %v1274_v49  ;;  %v1769_v54 = vsel %vm1408_vm1, %v1767_v32, %v1768_v14  ;;  %v2076_v45 = vrot.slane %v1948_v33, 2  ;;  %v296_v19 = vmul.f32 %v2439_v12, %v3398_v24 }
  0xfc   :  { %v1890_v17 = vadd.f32 %v1765_v4, %v1582_v16  ;;  %v240_v3 = vadd.f32 %v186_v38, %v130_v2  ;;  %v407_v43 = vmul.f32 %v2441_v13, %v3233_v60  ;;  %v716_v55 = vmul.f32 %v2451_v18, %v3330_v9 }
  0xfd   :  { %v1891_v25 = vadd.f32 %v1769_v54, %v1583_v37  ;;  %v2077_v1 = vsel %vm1408_vm1, %v2075_v10, %v2076_v45  ;;  %v1024_v30 = vmul.f32 %v2459_v23, %v3426_v44  ;;  %v3441_v61 = vmul.f32 %v2466_v31, %v3233_v60  ;;  %v3490_v54 = vld [vmem:[#allocation6 + $0x140] sm:$0xff] }
  0xfe   :  { %v2198_v4 = vadd.f32 %v2073_v11, %v1890_v17  ;;  %v350_v48 = vadd.f32 %v296_v19, %v240_v3  ;;  %v537_v59 = vrot.slane %v407_v43, 1  ;;  %v845_v15 = vrot.slane %v716_v55, 1 }
  0xff   :  { %v2199_v57 = vadd.f32 %v2077_v1, %v1891_v25  ;;  %v1153_v58 = vrot.slane %v1024_v30, 1  ;;  %v3445_v36 = vmul.f32 %v2473_v39, %v3330_v9  ;;  %v1462_v47 = vrot.slane %v3441_v61, 2 }
 0x100   :  { %2252 = vst [vmem:[#allocation7 + $0xe8] sm:$0x3] %v2198_v4  ;;  %v538_v56 = vsel %vm483_vm0, %v535_v40, %v537_v59  ;;  %v3451_v6 = vmul.f32 %v2481_v46, %v3426_v44  ;;  %v131_v11 = vmul.f32 %v2423_v5, %v3233_v60  ;;  %v846_v0 = vsel %vm483_vm0, %v843_v22, %v845_v15 }
 0x101   :  { %2253 = vst [vmem:[#allocation7 + $0xf0] sm:$0xff] %v2199_v57  ;;  %v659_v27 = vadd.f32 %v538_v56, %v350_v48  ;;  %v1154_v63 = vsel %vm483_vm0, %v1151_v51, %v1153_v58  ;;  %v1770_v35 = vrot.slane %v3445_v36, 2  ;;  %v1463_v34 = vsel %vm1408_vm1, %v1460_v21, %v1462_v47 }
 0x102   :  { %v2078_v40 = vrot.slane %v3451_v6, 2  ;;  %v187_v7 = vmul.f32 %v2429_v8, %v3330_v9  ;;  %v297_v26 = vmul.f32 %v2439_v12, %v3426_v44  ;;  %v132_v22 = vmul.f32 %v2423_v5, %v3274_v20 }
 0x103   :  { %v967_v29 = vadd.f32 %v846_v0, %v659_v27  ;;  %v1771_v60 = vsel %vm1408_vm1, %v1768_v14, %v1770_v35  ;;  %v188_v51 = vmul.f32 %v2429_v8, %v3371_v28  ;;  %v298_v21 = vmul.f32 %v2439_v12, %v3465_v52 }
 0x104   :  { %v2079_v41 = vsel %vm1408_vm1, %v2076_v45, %v2078_v40  ;;  %v241_v50 = vadd.f32 %v187_v7, %v131_v11  ;;  %v408_v32 = vmul.f32 %v2441_v13, %v3274_v20  ;;  %v3480_v42 = vmul.f32 %v2441_v13, %v3299_v62 }
 0x105   :  { %v1275_v49 = vadd.f32 %v1154_v63, %v967_v29  ;;  %v242_v14 = vadd.f32 %v188_v51, %v132_v22  ;;  %v717_v33 = vmul.f32 %v2451_v18, %v3371_v28  ;;  %v3486_v2 = vmul.f32 %v2451_v18, %v3398_v24 }
 0x106   :  { %v351_v16 = vadd.f32 %v297_v26, %v241_v50  ;;  %v539_v53 = vrot.slane %v408_v32, 1  ;;  %v1025_v38 = vmul.f32 %v2459_v23, %v3465_v52  ;;  %v540_v45 = vrot.slane %v3480_v42, 1 }
 0x107   :  { %v1584_v37 = vadd.f32 %v1463_v34, %v1275_v49  ;;  %v352_v10 = vadd.f32 %v298_v21, %v242_v14  ;;  %v847_v17 = vrot.slane %v717_v33, 1  ;;  %v848_v19 = vrot.slane %v3486_v2, 1  ;;  %v3519_v33 = vld [vmem:[#allocation6 + $0x148] sm:$0xf] }
 0x108   :  { %v660_v3 = vadd.f32 %v537_v59, %v351_v16  ;;  %v1026_v43 = vmul.f32 %v2459_v23, %v3490_v54  ;;  %v1155_v25 = vrot.slane %v1025_v38, 1  ;;  %v541_v55 = vsel %vm483_vm0, %v539_v53, %v540_v45 }
 0x109   :  { %v1892_v1 = vadd.f32 %v1771_v60, %v1584_v37  ;;  %v1333_v30 = vmul.f32 %v2466_v31, %v3274_v20  ;;  %v1334_v4 = vmul.f32 %v2466_v31, %v3299_v62  ;;  %v661_v61 = vadd.f32 %v541_v55, %v352_v10 }
 0x10a   :  { %v968_v48 = vadd.f32 %v845_v15, %v660_v3  ;;  %v849_v57 = vsel %vm483_vm0, %v847_v17, %v848_v19  ;;  %v1156_v59 = vrot.slane %v1026_v43, 1  ;;  %v1642_v27 = vmul.f32 %v2473_v39, %v3371_v28 }
 0x10b   :  { %v2200_v36 = vadd.f32 %v2079_v41, %v1892_v1  ;;  %v1464_v56 = vrot.slane %v1333_v30, 2  ;;  %v1465_v11 = vrot.slane %v1334_v4, 2  ;;  %v969_v63 = vadd.f32 %v849_v57, %v661_v61 }
 0x10c   :  { %v1276_v0 = vadd.f32 %v1153_v58, %v968_v48  ;;  %v1157_v34 = vsel %vm483_vm0, %v1155_v25, %v1156_v59  ;;  %v1643_v20 = vmul.f32 %v2473_v39, %v3398_v24  ;;  %v1772_v7 = vrot.slane %v1642_v27, 2 }
 0x10d   :  { %2254 = vst [vmem:[#allocation7 + $0xf8] sm:$0xff] %v2200_v36  ;;  %v1466_v15 = vsel %vm1408_vm1, %v1464_v56, %v1465_v11  ;;  %v1950_v26 = vmul.f32 %v2481_v46, %v3465_v52  ;;  %v1951_v29 = vmul.f32 %v2481_v46, %v3490_v54  ;;  %v1277_v22 = vadd.f32 %v1157_v34, %v969_v63 }
 0x10e   :  { %v1585_v60 = vadd.f32 %v1462_v47, %v1276_v0  ;;  %v1773_v51 = vrot.slane %v1643_v20, 2  ;;  %v133_v58 = vmul.f32 %v2423_v5, %v3299_v62  ;;  %v189_v21 = vmul.f32 %v2429_v8, %v3398_v24 }
 0x10f   :  { %v2080_v41 = vrot.slane %v1950_v26, 2  ;;  %v2081_v50 = vrot.slane %v1951_v29, 2  ;;  %v299_v32 = vmul.f32 %v2439_v12, %v3490_v54  ;;  %v1586_v14 = vadd.f32 %v1466_v15, %v1277_v22 }
 0x110   :  { %v1893_v49 = vadd.f32 %v1770_v35, %v1585_v60  ;;  %v1774_v42 = vsel %vm1408_vm1, %v1772_v7, %v1773_v51  ;;  %v410_v47 = vmul.f32 %v2441_v13, %v3330_v9  ;;  %v243_v62 = vadd.f32 %v189_v21, %v133_v58 }
 0x111   :  { %v2082_v16 = vsel %vm1408_vm1, %v2080_v41, %v2081_v50  ;;  %v719_v53 = vmul.f32 %v2451_v18, %v3426_v44  ;;  %v1027_v2 = vmul.f32 %v2459_v23, %v3519_v33  ;;  %v1894_v38 = vadd.f32 %v1774_v42, %v1586_v14 }
 0x112   :  { %v2201_v35 = vadd.f32 %v2078_v40, %v1893_v49  ;;  %v542_v37 = vrot.slane %v410_v47, 1  ;;  %v3532_v10 = vmul.f32 %v2466_v31, %v3330_v9  ;;  %v353_v17 = vadd.f32 %v299_v32, %v243_v62 }
 0x113   :  { %v850_v3 = vrot.slane %v719_v53, 1  ;;  %v1158_v43 = vrot.slane %v1027_v2, 1  ;;  %v3536_v25 = vmul.f32 %v2473_v39, %v3426_v44  ;;  %v2202_v1 = vadd.f32 %v2082_v16, %v1894_v38 }
 0x114   :  { %2255 = vst [vmem:[#allocation7 + $0x100] sm:$0x3] %v2201_v35  ;;  %v543_v55 = vsel %vm483_vm0, %v540_v45, %v542_v37  ;;  %v1467_v6 = vrot.slane %v3532_v10, 2  ;;  %v3542_v40 = vmul.f32 %v2481_v46, %v3519_v33  ;;  %v134_v45 = vmul.f32 %v2423_v5, %v3330_v9 }
 0x115   :  { %v662_v30 = vadd.f32 %v543_v55, %v353_v17  ;;  %v851_v4 = vsel %vm483_vm0, %v848_v19, %v850_v3  ;;  %v1159_v48 = vsel %vm483_vm0, %v1156_v59, %v1158_v43  ;;  %v1775_v61 = vrot.slane %v3536_v25, 2  ;;  %2256 = vst [vmem:[#allocation7 + $0x108] sm:$0xff] %v2202_v1  ;;  %v3556_v59 = vld [vmem:[#allocation6 + $0x150] sm:$0xff] }
 0x116   :  { %v1468_v57 = vsel %vm1408_vm1, %v1465_v11, %v1467_v6  ;;  %v2083_v36 = vrot.slane %v3542_v40, 2  ;;  %v190_v56 = vmul.f32 %v2429_v8, %v3426_v44  ;;  %v300_v19 = vmul.f32 %v2439_v12, %v3519_v33 }
 0x117   :  { %v970_v27 = vadd.f32 %v851_v4, %v662_v30  ;;  %v1776_v0 = vsel %vm1408_vm1, %v1773_v51, %v1775_v61  ;;  %v135_v63 = vmul.f32 %v2423_v5, %v3371_v28  ;;  %v191_v9 = vmul.f32 %v2429_v8, %v3465_v52 }
 0x118   :  { %v2084_v11 = vsel %vm1408_vm1, %v2081_v50, %v2083_v36  ;;  %v244_v34 = vadd.f32 %v190_v56, %v134_v45  ;;  %v301_v20 = vmul.f32 %v2439_v12, %v3556_v59  ;;  %v411_v7 = vmul.f32 %v2441_v13, %v3371_v28  ;;  %v3581_v50 = vld [vmem:[#allocation6 + $0x158] sm:$0xff] }
 0x119   :  { %v1278_v15 = vadd.f32 %v1159_v48, %v970_v27  ;;  %v3571_v26 = vmul.f32 %v2441_v13, %v3398_v24  ;;  %v720_v29 = vmul.f32 %v2451_v18, %v3465_v52  ;;  %v245_v22 = vadd.f32 %v191_v9, %v135_v63 }
 0x11a   :  { %v354_v60 = vadd.f32 %v300_v19, %v244_v34  ;;  %v3577_v51 = vmul.f32 %v2451_v18, %v3490_v54  ;;  %v1028_v58 = vmul.f32 %v2459_v23, %v3556_v59  ;;  %v544_v21 = vrot.slane %v411_v7, 1 }
 0x11b   :  { %v1587_v41 = vadd.f32 %v1468_v57, %v1278_v15  ;;  %v545_v32 = vrot.slane %v3571_v26, 1  ;;  %v852_v49 = vrot.slane %v720_v29, 1  ;;  %v355_v42 = vadd.f32 %v301_v20, %v245_v22 }
 0x11c   :  { %v663_v14 = vadd.f32 %v542_v37, %v354_v60  ;;  %v853_v47 = vrot.slane %v3577_v51, 1  ;;  %v1029_v16 = vmul.f32 %v2459_v23, %v3581_v50  ;;  %v1160_v2 = vrot.slane %v1028_v58, 1  ;;  %v3611_v60 = vld [vmem:[#allocation6 + $0x160] sm:$0xf] }
 0x11d   :  { %v1895_v62 = vadd.f32 %v1776_v0, %v1587_v41  ;;  %v546_v53 = vsel %vm483_vm0, %v544_v21, %v545_v32  ;;  %v1336_v35 = vmul.f32 %v2466_v31, %v3371_v28  ;;  %v1337_v37 = vmul.f32 %v2466_v31, %v3398_v24 }
 0x11e   :  { %v971_v38 = vadd.f32 %v850_v3, %v663_v14  ;;  %v664_v10 = vadd.f32 %v546_v53, %v355_v42  ;;  %v854_v17 = vsel %vm483_vm0, %v852_v49, %v853_v47  ;;  %v1161_v25 = vrot.slane %v1029_v16, 1 }
 0x11f   :  { %v2203_v1 = vadd.f32 %v2084_v11, %v1895_v62  ;;  %v1469_v55 = vrot.slane %v1336_v35, 2  ;;  %v1645_v30 = vmul.f32 %v2473_v39, %v3465_v52  ;;  %v1646_v28 = vmul.f32 %v2473_v39, %v3490_v54 }
 0x120   :  { %v1279_v4 = vadd.f32 %v1158_v43, %v971_v38  ;;  %v972_v48 = vadd.f32 %v854_v17, %v664_v10  ;;  %v1162_v57 = vsel %vm483_vm0, %v1160_v2, %v1161_v25  ;;  %v1470_v3 = vrot.slane %v1337_v37, 2 }
 0x121   :  { %2257 = vst [vmem:[#allocation7 + $0x110] sm:$0xff] %v2203_v1  ;;  %v1777_v45 = vrot.slane %v1645_v30, 2  ;;  %v1953_v56 = vmul.f32 %v2481_v46, %v3556_v59  ;;  %v1954_v27 = vmul.f32 %v2481_v46, %v3581_v50  ;;  %v1778_v63 = vrot.slane %v1646_v28, 2 }
 0x122   :  { %v1588_v0 = vadd.f32 %v1467_v6, %v1279_v4  ;;  %v1280_v19 = vadd.f32 %v1162_v57, %v972_v48  ;;  %v136_v43 = vmul.f32 %v2423_v5, %v3398_v24  ;;  %v1471_v11 = vsel %vm1408_vm1, %v1469_v55, %v1470_v3  ;;  %v3652_v4 = vld [vmem:[#allocation6 + $0x168] sm:$0xff] }
 0x123   :  { %v2085_v34 = vrot.slane %v1953_v56, 2  ;;  %v2086_v9 = vrot.slane %v1954_v27, 2  ;;  %v192_v20 = vmul.f32 %v2429_v8, %v3490_v54  ;;  %v1779_v26 = vsel %vm1408_vm1, %v1777_v45, %v1778_v63 }
 0x124   :  { %v1896_v15 = vadd.f32 %v1775_v61, %v1588_v0  ;;  %v1589_v7 = vadd.f32 %v1471_v11, %v1280_v19  ;;  %v302_v29 = vmul.f32 %v2439_v12, %v3581_v50  ;;  %v413_v24 = vmul.f32 %v2441_v13, %v3426_v44 }
 0x125   :  { %v2087_v6 = vsel %vm1408_vm1, %v2085_v34, %v2086_v9  ;;  %v246_v22 = vadd.f32 %v192_v20, %v136_v43  ;;  %v722_v51 = vmul.f32 %v2451_v18, %v3519_v33  ;;  %v3621_v41 = vmul.f32 %v2459_v23, %v3611_v60  ;;  %v3677_v34 = vld [vmem:[#allocation6 + $0x170] sm:$0xff] }
 0x126   :  { %v2204_v61 = vadd.f32 %v2083_v36, %v1896_v15  ;;  %v1897_v58 = vadd.f32 %v1779_v26, %v1589_v7  ;;  %v3625_v21 = vmul.f32 %v2466_v31, %v3426_v44  ;;  %v547_v14 = vrot.slane %v413_v24, 1 }
 0x127   :  { %v356_v49 = vadd.f32 %v302_v29, %v246_v22  ;;  %v855_v42 = vrot.slane %v722_v51, 1  ;;  %v3629_v16 = vmul.f32 %v2473_v39, %v3519_v33  ;;  %v1163_v40 = vrot.slane %v3621_v41, 1 }
 0x128   :  { %2258 = vst [vmem:[#allocation7 + $0x118] sm:$0x3] %v2204_v61  ;;  %v2205_v62 = vadd.f32 %v2087_v6, %v1897_v58  ;;  %v1472_v36 = vrot.slane %v3625_v21, 2  ;;  %v3635_v53 = vmul.f32 %v2481_v46, %v3611_v60  ;;  %v548_v2 = vsel %vm483_vm0, %v545_v32, %v547_v14 }
 0x129   :  { %v856_v35 = vsel %vm483_vm0, %v853_v47, %v855_v42  ;;  %v1780_v38 = vrot.slane %v3629_v16, 2  ;;  %v137_v10 = vmul.f32 %v2423_v5, %v3426_v44  ;;  %v665_v17 = vadd.f32 %v548_v2, %v356_v49 }
 0x12a   :  { %2259 = vst [vmem:[#allocation7 + $0x120] sm:$0xff] %v2205_v62  ;;  %v1164_v1 = vsel %vm483_vm0, %v1161_v25, %v1163_v40  ;;  %v1473_v37 = vsel %vm1408_vm1, %v1470_v3, %v1472_v36  ;;  %v2088_v55 = vrot.slane %v3635_v53, 2  ;;  %v193_v32 = vmul.f32 %v2429_v8, %v3519_v33 }
 0x12b   :  { %v1781_v30 = vsel %vm1408_vm1, %v1778_v63, %v1780_v38  ;;  %v303_v47 = vmul.f32 %v2439_v12, %v3611_v60  ;;  %v138_v44 = vmul.f32 %v2423_v5, %v3465_v52  ;;  %v973_v25 = vadd.f32 %v856_v35, %v665_v17 }
 0x12c   :  { %v2089_v48 = vsel %vm1408_vm1, %v2086_v9, %v2088_v55  ;;  %v194_v57 = vmul.f32 %v2429_v8, %v3556_v59  ;;  %v304_v28 = vmul.f32 %v2439_v12, %v3652_v4  ;;  %v247_v3 = vadd.f32 %v193_v32, %v137_v10 }
 0x12d   :  { %v414_v45 = vmul.f32 %v2441_v13, %v3465_v52  ;;  %v3667_v56 = vmul.f32 %v2441_v13, %v3490_v54  ;;  %v723_v27 = vmul.f32 %v2451_v18, %v3556_v59  ;;  %v1281_v0 = vadd.f32 %v1164_v1, %v973_v25 }
 0x12e   :  { %v248_v19 = vadd.f32 %v194_v57, %v138_v44  ;;  %v3673_v63 = vmul.f32 %v2451_v18, %v3581_v50  ;;  %v1031_v43 = vmul.f32 %v2459_v23, %v3652_v4  ;;  %v357_v11 = vadd.f32 %v303_v47, %v247_v3 }
 0x12f   :  { %v549_v9 = vrot.slane %v414_v45, 1  ;;  %v550_v20 = vrot.slane %v3667_v56, 1  ;;  %v857_v15 = vrot.slane %v723_v27, 1  ;;  %v1590_v7 = vadd.f32 %v1473_v37, %v1281_v0 }
 0x130   :  { %v358_v26 = vadd.f32 %v304_v28, %v248_v19  ;;  %v858_v29 = vrot.slane %v3673_v63, 1  ;;  %v1032_v6 = vmul.f32 %v2459_v23, %v3677_v34  ;;  %v666_v22 = vadd.f32 %v547_v14, %v357_v11  ;;  %v3708_v63 = vld [vmem:[#allocation6 + $0x178] sm:$0xf] }
 0x131   :  { %v551_v24 = vsel %vm483_vm0, %v549_v9, %v550_v20  ;;  %v1165_v51 = vrot.slane %v1031_v43, 1  ;;  %v1339_v61 = vmul.f32 %v2466_v31, %v3465_v52  ;;  %v1898_v58 = vadd.f32 %v1781_v30, %v1590_v7 }
 0x132   :  { %v667_v41 = vadd.f32 %v551_v24, %v358_v26  ;;  %v859_v21 = vsel %vm483_vm0, %v857_v15, %v858_v29  ;;  %v1166_v49 = vrot.slane %v1032_v6, 1  ;;  %v974_v62 = vadd.f32 %v855_v42, %v666_v22 }
 0x133   :  { %v1340_v2 = vmul.f32 %v2466_v31, %v3490_v54  ;;  %v1474_v35 = vrot.slane %v1339_v61, 2  ;;  %v1648_v10 = vmul.f32 %v2473_v39, %v3556_v59  ;;  %v2206_v14 = vadd.f32 %v2089_v48, %v1898_v58 }
 0x134   :  { %v975_v17 = vadd.f32 %v859_v21, %v667_v41  ;;  %v1167_v1 = vsel %vm483_vm0, %v1165_v51, %v1166_v49  ;;  %v1649_v52 = vmul.f32 %v2473_v39, %v3581_v50  ;;  %v1282_v37 = vadd.f32 %v1163_v40, %v974_v62 }
 0x135   :  { %v1475_v30 = vrot.slane %v1340_v2, 2  ;;  %v1782_v32 = vrot.slane %v1648_v10, 2  ;;  %v1956_v42 = vmul.f32 %v2481_v46, %v3652_v4  ;;  %2260 = vst [vmem:[#allocation7 + $0x128] sm:$0xff] %v2206_v14  ;;  %v1957_v25 = vmul.f32 %v2481_v46, %v3677_v34  ;;  %v3749_v14 = vld [vmem:[#allocation6 + $0x180] sm:$0xff] }
 0x136   :  { %v1283_v47 = vadd.f32 %v1167_v1, %v975_v17  ;;  %v1783_v44 = vrot.slane %v1649_v52, 2  ;;  %v139_v48 = vmul.f32 %v2423_v5, %v3490_v54  ;;  %v1591_v57 = vadd.f32 %v1472_v36, %v1282_v37 }
 0x137   :  { %v1476_v28 = vsel %vm1408_vm1, %v1474_v35, %v1475_v30  ;;  %v2090_v3 = vrot.slane %v1956_v42, 2  ;;  %v195_v40 = vmul.f32 %v2429_v8, %v3581_v50  ;;  %v2091_v27 = vrot.slane %v1957_v25, 2 }
 0x138   :  { %v1592_v45 = vadd.f32 %v1476_v28, %v1283_v47  ;;  %v1784_v56 = vsel %vm1408_vm1, %v1782_v32, %v1783_v44  ;;  %v305_v0 = vmul.f32 %v2439_v12, %v3677_v34  ;;  %v1899_v19 = vadd.f32 %v1780_v38, %v1591_v57 }
 0x139   :  { %v249_v54 = vadd.f32 %v195_v40, %v139_v48  ;;  %v416_v36 = vmul.f32 %v2441_v13, %v3519_v33  ;;  %v725_v43 = vmul.f32 %v2451_v18, %v3611_v60  ;;  %v2092_v9 = vsel %vm1408_vm1, %v2090_v3, %v2091_v27 }
 0x13a   :  { %v1900_v11 = vadd.f32 %v1784_v56, %v1592_v45  ;;  %v3717_v15 = vmul.f32 %v2459_v23, %v3708_v63  ;;  %v3721_v16 = vmul.f32 %v2466_v31, %v3519_v33  ;;  %v2207_v38 = vadd.f32 %v2088_v55, %v1899_v19  ;;  %v3776_v56 = vld [vmem:[#allocation6 + $0x188] sm:$0xff] }
 0x13b   :  { %v359_v7 = vadd.f32 %v305_v0, %v249_v54  ;;  %v552_v26 = vrot.slane %v416_v36, 1  ;;  %v860_v6 = vrot.slane %v725_v43, 1  ;;  %v3729_v61 = vmul.f32 %v2473_v39, %v3611_v60 }
 0x13c   :  { %v2208_v22 = vadd.f32 %v2092_v9, %v1900_v11  ;;  %v1168_v24 = vrot.slane %v3717_v15, 1  ;;  %v1477_v51 = vrot.slane %v3721_v16, 2  ;;  %2261 = vst [vmem:[#allocation7 + $0x130] sm:$0x3] %v2207_v38  ;;  %v3735_v53 = vmul.f32 %v2481_v46, %v3708_v63 }
 0x13d   :  { %v553_v58 = vsel %vm483_vm0, %v550_v20, %v552_v26  ;;  %v861_v41 = vsel %vm483_vm0, %v858_v29, %v860_v6  ;;  %v140_v55 = vmul.f32 %v2423_v5, %v3519_v33  ;;  %v1785_v35 = vrot.slane %v3729_v61, 2 }
 0x13e   :  { %2262 = vst [vmem:[#allocation7 + $0x138] sm:$0xff] %v2208_v22  ;;  %v668_v21 = vadd.f32 %v553_v58, %v359_v7  ;;  %v1169_v62 = vsel %vm483_vm0, %v1166_v49, %v1168_v24  ;;  %v1478_v2 = vsel %vm1408_vm1, %v1475_v30, %v1477_v51  ;;  %v2093_v20 = vrot.slane %v3735_v53, 2 }
 0x13f   :  { %v196_v29 = vmul.f32 %v2429_v8, %v3611_v60  ;;  %v306_v10 = vmul.f32 %v2439_v12, %v3708_v63  ;;  %v141_v33 = vmul.f32 %v2423_v5, %v3556_v59  ;;  %v1786_v17 = vsel %vm1408_vm1, %v1783_v44, %v1785_v35 }
 0x140   :  { %v976_v49 = vadd.f32 %v861_v41, %v668_v21  ;;  %v197_v1 = vmul.f32 %v2429_v8, %v3652_v4  ;;  %v307_v52 = vmul.f32 %v2439_v12, %v3749_v14  ;;  %v2094_v37 = vsel %vm1408_vm1, %v2091_v27, %v2093_v20 }
 0x141   :  { %v250_v30 = vadd.f32 %v196_v29, %v140_v55  ;;  %v417_v32 = vmul.f32 %v2441_v13, %v3556_v59  ;;  %v3765_v42 = vmul.f32 %v2441_v13, %v3581_v50  ;;  %v726_v25 = vmul.f32 %v2451_v18, %v3652_v4 }
 0x142   :  { %v1284_v47 = vadd.f32 %v1169_v62, %v976_v49  ;;  %v251_v44 = vadd.f32 %v197_v1, %v141_v33  ;;  %v3771_v48 = vmul.f32 %v2451_v18, %v3677_v34  ;;  %v1034_v40 = vmul.f32 %v2459_v23, %v3749_v14 }
 0x143   :  { %v360_v57 = vadd.f32 %v306_v10, %v250_v30  ;;  %v554_v28 = vrot.slane %v417_v32, 1  ;;  %v555_v3 = vrot.slane %v3765_v42, 1  ;;  %v862_v0 = vrot.slane %v726_v25, 1  ;;  %v3804_v25 = vld [vmem:[#allocation6 + $0x190] sm:$0xf] }
 0x144   :  { %v1593_v45 = vadd.f32 %v1478_v2, %v1284_v47  ;;  %v361_v27 = vadd.f32 %v307_v52, %v251_v44  ;;  %v863_v19 = vrot.slane %v3771_v48, 1  ;;  %v1035_v43 = vmul.f32 %v2459_v23, %v3776_v56 }
 0x145   :  { %v669_v54 = vadd.f32 %v552_v26, %v360_v57  ;;  %v556_v36 = vsel %vm483_vm0, %v554_v28, %v555_v3  ;;  %v1170_v11 = vrot.slane %v1034_v40, 1  ;;  %v1342_v7 = vmul.f32 %v2466_v31, %v3556_v59 }
 0x146   :  { %v1901_v9 = vadd.f32 %v1786_v17, %v1593_v45  ;;  %v670_v15 = vadd.f32 %v556_v36, %v361_v27  ;;  %v864_v38 = vsel %vm483_vm0, %v862_v0, %v863_v19  ;;  %v1171_v61 = vrot.slane %v1035_v43, 1 }
 0x147   :  { %v977_v22 = vadd.f32 %v860_v6, %v669_v54  ;;  %v1343_v58 = vmul.f32 %v2466_v31, %v3581_v50  ;;  %v1651_v26 = vmul.f32 %v2473_v39, %v3652_v4  ;;  %v1479_v21 = vrot.slane %v1342_v7, 2 }
 0x148   :  { %v2209_v41 = vadd.f32 %v2094_v37, %v1901_v9  ;;  %v978_v55 = vadd.f32 %v864_v38, %v670_v15  ;;  %v1652_v62 = vmul.f32 %v2473_v39, %v3677_v34  ;;  %v1172_v29 = vsel %vm483_vm0, %v1170_v11, %v1171_v61 }
 0x149   :  { %v1285_v2 = vadd.f32 %v1168_v24, %v977_v22  ;;  %v1480_v10 = vrot.slane %v1343_v58, 2  ;;  %v1787_v33 = vrot.slane %v1651_v26, 2  ;;  %v1959_v49 = vmul.f32 %v2481_v46, %v3749_v14 }
 0x14a   :  { %2263 = vst [vmem:[#allocation7 + $0x140] sm:$0xff] %v2209_v41  ;;  %v1286_v59 = vadd.f32 %v1172_v29, %v978_v55  ;;  %v1788_v6 = vrot.slane %v1652_v62, 2  ;;  %v1960_v17 = vmul.f32 %v2481_v46, %v3776_v56  ;;  %v142_v24 = vmul.f32 %v2423_v5, %v3581_v50  ;;  %v3843_v62 = vld [vmem:[#allocation6 + $0x198] sm:$0xff] }
 0x14b   :  { %v1594_v1 = vadd.f32 %v1477_v51, %v1285_v2  ;;  %v1481_v52 = vsel %vm1408_vm1, %v1479_v21, %v1480_v10  ;;  %v198_v37 = vmul.f32 %v2429_v8, %v3677_v34  ;;  %v2095_v42 = vrot.slane %v1959_v49, 2 }
 0x14c   :  { %v1595_v30 = vadd.f32 %v1481_v52, %v1286_v59  ;;  %v1789_v32 = vsel %vm1408_vm1, %v1787_v33, %v1788_v6  ;;  %v2096_v47 = vrot.slane %v1960_v17, 2  ;;  %v308_v16 = vmul.f32 %v2439_v12, %v3776_v56 }
 0x14d   :  { %v1902_v44 = vadd.f32 %v1785_v35, %v1594_v1  ;;  %v252_v48 = vadd.f32 %v198_v37, %v142_v24  ;;  %v419_v51 = vmul.f32 %v2441_v13, %v3611_v60  ;;  %v728_v28 = vmul.f32 %v2451_v18, %v3708_v63 }
 0x14e   :  { %v1903_v57 = vadd.f32 %v1789_v32, %v1595_v30  ;;  %v2097_v50 = vsel %vm1408_vm1, %v2095_v42, %v2096_v47  ;;  %v1036_v40 = vmul.f32 %v2459_v23, %v3804_v25  ;;  %v3819_v0 = vmul.f32 %v2466_v31, %v3611_v60  ;;  %v3868_v32 = vld [vmem:[#allocation6 + $0x1a0] sm:$0xff] }
 0x14f   :  { %v2210_v35 = vadd.f32 %v2093_v20, %v1902_v44  ;;  %v362_v45 = vadd.f32 %v308_v16, %v252_v48  ;;  %v557_v27 = vrot.slane %v419_v51, 1  ;;  %v865_v36 = vrot.slane %v728_v28, 1 }
 0x150   :  { %v2211_v54 = vadd.f32 %v2097_v50, %v1903_v57  ;;  %v1173_v43 = vrot.slane %v1036_v40, 1  ;;  %v3823_v11 = vmul.f32 %v2473_v39, %v3708_v63  ;;  %v1482_v15 = vrot.slane %v3819_v0, 2 }
 0x151   :  { %2264 = vst [vmem:[#allocation7 + $0x148] sm:$0x3] %v2210_v35  ;;  %v558_v9 = vsel %vm483_vm0, %v555_v3, %v557_v27  ;;  %v3829_v53 = vmul.f32 %v2481_v46, %v3804_v25  ;;  %v143_v20 = vmul.f32 %v2423_v5, %v3611_v60  ;;  %v866_v7 = vsel %vm483_vm0, %v863_v19, %v865_v36 }
 0x152   :  { %2265 = vst [vmem:[#allocation7 + $0x150] sm:$0xff] %v2211_v54  ;;  %v671_v38 = vadd.f32 %v558_v9, %v362_v45  ;;  %v1174_v22 = vsel %vm483_vm0, %v1171_v61, %v1173_v43  ;;  %v1790_v58 = vrot.slane %v3823_v11, 2  ;;  %v1483_v26 = vsel %vm1408_vm1, %v1480_v10, %v1482_v15 }
 0x153   :  { %v2098_v3 = vrot.slane %v3829_v53, 2  ;;  %v199_v41 = vmul.f32 %v2429_v8, %v3708_v63  ;;  %v309_v55 = vmul.f32 %v2439_v12, %v3804_v25  ;;  %v144_v19 = vmul.f32 %v2423_v5, %v3652_v4 }
 0x154   :  { %v979_v21 = vadd.f32 %v866_v7, %v671_v38  ;;  %v1791_v60 = vsel %vm1408_vm1, %v1788_v6, %v1790_v58  ;;  %v200_v61 = vmul.f32 %v2429_v8, %v3749_v14  ;;  %v310_v10 = vmul.f32 %v2439_v12, %v3843_v62 }
 0x155   :  { %v2099_v2 = vsel %vm1408_vm1, %v2096_v47, %v2098_v3  ;;  %v253_v29 = vadd.f32 %v199_v41, %v143_v20  ;;  %v420_v33 = vmul.f32 %v2441_v13, %v3652_v4  ;;  %v3858_v49 = vmul.f32 %v2441_v13, %v3677_v34 }
 0x156   :  { %v1287_v59 = vadd.f32 %v1174_v22, %v979_v21  ;;  %v254_v6 = vadd.f32 %v200_v61, %v144_v19  ;;  %v729_v17 = vmul.f32 %v2451_v18, %v3749_v14  ;;  %v3864_v24 = vmul.f32 %v2451_v18, %v3776_v56 }
 0x157   :  { %v363_v1 = vadd.f32 %v309_v55, %v253_v29  ;;  %v559_v52 = vrot.slane %v420_v33, 1  ;;  %v1037_v37 = vmul.f32 %v2459_v23, %v3843_v62  ;;  %v560_v47 = vrot.slane %v3858_v49, 1 }
 0x158   :  { %v1596_v30 = vadd.f32 %v1483_v26, %v1287_v59  ;;  %v364_v42 = vadd.f32 %v310_v10, %v254_v6  ;;  %v867_v44 = vrot.slane %v729_v17, 1  ;;  %v868_v16 = vrot.slane %v3864_v24, 1  ;;  %v3897_v17 = vld [vmem:[#allocation6 + $0x1a8] sm:$0xf] }
 0x159   :  { %v672_v48 = vadd.f32 %v557_v27, %v363_v1  ;;  %v1038_v51 = vmul.f32 %v2459_v23, %v3868_v32  ;;  %v1175_v57 = vrot.slane %v1037_v37, 1  ;;  %v561_v28 = vsel %vm483_vm0, %v559_v52, %v560_v47 }
 0x15a   :  { %v1904_v50 = vadd.f32 %v1791_v60, %v1596_v30  ;;  %v1345_v40 = vmul.f32 %v2466_v31, %v3652_v4  ;;  %v1346_v35 = vmul.f32 %v2466_v31, %v3677_v34  ;;  %v673_v0 = vadd.f32 %v561_v28, %v364_v42 }
 0x15b   :  { %v980_v45 = vadd.f32 %v865_v36, %v672_v48  ;;  %v869_v54 = vsel %vm483_vm0, %v867_v44, %v868_v16  ;;  %v1176_v27 = vrot.slane %v1038_v51, 1  ;;  %v1654_v38 = vmul.f32 %v2473_v39, %v3749_v14 }
 0x15c   :  { %v2212_v11 = vadd.f32 %v2099_v2, %v1904_v50  ;;  %v1484_v9 = vrot.slane %v1345_v40, 2  ;;  %v1485_v20 = vrot.slane %v1346_v35, 2  ;;  %v981_v22 = vadd.f32 %v869_v54, %v673_v0 }
 0x15d   :  { %v1288_v7 = vadd.f32 %v1173_v43, %v980_v45  ;;  %v1177_v26 = vsel %vm483_vm0, %v1175_v57, %v1176_v27  ;;  %v1655_v4 = vmul.f32 %v2473_v39, %v3776_v56  ;;  %v1792_v41 = vrot.slane %v1654_v38, 2 }
 0x15e   :  { %2266 = vst [vmem:[#allocation7 + $0x158] sm:$0xff] %v2212_v11  ;;  %v1486_v36 = vsel %vm1408_vm1, %v1484_v9, %v1485_v20  ;;  %v1962_v55 = vmul.f32 %v2481_v46, %v3843_v62  ;;  %v1963_v21 = vmul.f32 %v2481_v46, %v3868_v32  ;;  %v1289_v19 = vadd.f32 %v1177_v26, %v981_v22 }
 0x15f   :  { %v1597_v60 = vadd.f32 %v1482_v15, %v1288_v7  ;;  %v1793_v61 = vrot.slane %v1655_v4, 2  ;;  %v145_v43 = vmul.f32 %v2423_v5, %v3677_v34  ;;  %v201_v10 = vmul.f32 %v2429_v8, %v3776_v56 }
 0x160   :  { %v2100_v2 = vrot.slane %v1962_v55, 2  ;;  %v2101_v29 = vrot.slane %v1963_v21, 2  ;;  %v311_v33 = vmul.f32 %v2439_v12, %v3868_v32  ;;  %v1598_v6 = vadd.f32 %v1486_v36, %v1289_v19 }
 0x161   :  { %v1905_v59 = vadd.f32 %v1790_v58, %v1597_v60  ;;  %v1794_v49 = vsel %vm1408_vm1, %v1792_v41, %v1793_v61  ;;  %v422_v15 = vmul.f32 %v2441_v13, %v3708_v63  ;;  %v255_v34 = vadd.f32 %v201_v10, %v145_v43 }
 0x162   :  { %v2102_v1 = vsel %vm1408_vm1, %v2100_v2, %v2101_v29  ;;  %v731_v52 = vmul.f32 %v2451_v18, %v3804_v25  ;;  %v1039_v24 = vmul.f32 %v2459_v23, %v3897_v17  ;;  %v1906_v37 = vadd.f32 %v1794_v49, %v1598_v6 }
 0x163   :  { %v2213_v58 = vadd.f32 %v2098_v3, %v1905_v59  ;;  %v562_v30 = vrot.slane %v422_v15, 1  ;;  %v3910_v42 = vmul.f32 %v2466_v31, %v3708_v63  ;;  %v365_v44 = vadd.f32 %v311_v33, %v255_v34 }
 0x164   :  { %v870_v48 = vrot.slane %v731_v52, 1  ;;  %v1178_v51 = vrot.slane %v1039_v24, 1  ;;  %v3914_v57 = vmul.f32 %v2473_v39, %v3804_v25  ;;  %v2214_v50 = vadd.f32 %v2102_v1, %v1906_v37 }
 0x165   :  { %2267 = vst [vmem:[#allocation7 + $0x160] sm:$0x3] %v2213_v58  ;;  %v563_v28 = vsel %vm483_vm0, %v560_v47, %v562_v30  ;;  %v1487_v53 = vrot.slane %v3910_v42, 2  ;;  %v3920_v3 = vmul.f32 %v2481_v46, %v3897_v17  ;;  %v146_v47 = vmul.f32 %v2423_v5, %v3708_v63 }
 0x166   :  { %v674_v40 = vadd.f32 %v563_v28, %v365_v44  ;;  %v871_v35 = vsel %vm483_vm0, %v868_v16, %v870_v48  ;;  %v1179_v45 = vsel %vm483_vm0, %v1176_v27, %v1178_v51  ;;  %v1795_v0 = vrot.slane %v3914_v57, 2  ;;  %2268 = vst [vmem:[#allocation7 + $0x168] sm:$0xff] %v2214_v50  ;;  %v3934_v27 = vld [vmem:[#allocation6 + $0x1b0] sm:$0xff] }
 0x167   :  { %v1488_v54 = vsel %vm1408_vm1, %v1485_v20, %v1487_v53  ;;  %v2103_v11 = vrot.slane %v3920_v3, 2  ;;  %v202_v9 = vmul.f32 %v2429_v8, %v3804_v25  ;;  %v312_v16 = vmul.f32 %v2439_v12, %v3897_v17 }
 0x168   :  { %v982_v38 = vadd.f32 %v871_v35, %v674_v40  ;;  %v1796_v7 = vsel %vm1408_vm1, %v1793_v61, %v1795_v0  ;;  %v147_v22 = vmul.f32 %v2423_v5, %v3749_v14  ;;  %v203_v63 = vmul.f32 %v2429_v8, %v3843_v62 }
 0x169   :  { %v2104_v20 = vsel %vm1408_vm1, %v2101_v29, %v2103_v11  ;;  %v256_v26 = vadd.f32 %v202_v9, %v146_v47  ;;  %v313_v4 = vmul.f32 %v2439_v12, %v3934_v27  ;;  %v423_v41 = vmul.f32 %v2441_v13, %v3749_v14  ;;  %v3959_v29 = vld [vmem:[#allocation6 + $0x1b8] sm:$0xff] }
 0x16a   :  { %v1290_v36 = vadd.f32 %v1179_v45, %v982_v38  ;;  %v3949_v55 = vmul.f32 %v2441_v13, %v3776_v56  ;;  %v732_v21 = vmul.f32 %v2451_v18, %v3843_v62  ;;  %v257_v19 = vadd.f32 %v203_v63, %v147_v22 }
 0x16b   :  { %v366_v60 = vadd.f32 %v312_v16, %v256_v26  ;;  %v3955_v61 = vmul.f32 %v2451_v18, %v3868_v32  ;;  %v1040_v43 = vmul.f32 %v2459_v23, %v3934_v27  ;;  %v564_v10 = vrot.slane %v423_v41, 1 }
 0x16c   :  { %v1599_v2 = vadd.f32 %v1488_v54, %v1290_v36  ;;  %v565_v33 = vrot.slane %v3949_v55, 1  ;;  %v872_v59 = vrot.slane %v732_v21, 1  ;;  %v367_v49 = vadd.f32 %v313_v4, %v257_v19 }
 0x16d   :  { %v675_v6 = vadd.f32 %v562_v30, %v366_v60  ;;  %v873_v15 = vrot.slane %v3955_v61, 1  ;;  %v1041_v1 = vmul.f32 %v2459_v23, %v3959_v29  ;;  %v1180_v24 = vrot.slane %v1040_v43, 1  ;;  %v3989_v60 = vld [vmem:[#allocation6 + $0x1c0] sm:$0xf] }
 0x16e   :  { %v1907_v34 = vadd.f32 %v1796_v7, %v1599_v2  ;;  %v566_v52 = vsel %vm483_vm0, %v564_v10, %v565_v33  ;;  %v1348_v58 = vmul.f32 %v2466_v31, %v3749_v14  ;;  %v1349_v30 = vmul.f32 %v2466_v31, %v3776_v56 }
 0x16f   :  { %v983_v37 = vadd.f32 %v870_v48, %v675_v6  ;;  %v676_v42 = vadd.f32 %v566_v52, %v367_v49  ;;  %v874_v44 = vsel %vm483_vm0, %v872_v59, %v873_v15  ;;  %v1181_v57 = vrot.slane %v1041_v1, 1 }
 0x170   :  { %v2215_v50 = vadd.f32 %v2104_v20, %v1907_v34  ;;  %v1489_v28 = vrot.slane %v1348_v58, 2  ;;  %v1657_v40 = vmul.f32 %v2473_v39, %v3843_v62  ;;  %v1658_v14 = vmul.f32 %v2473_v39, %v3868_v32 }
 0x171   :  { %v1291_v35 = vadd.f32 %v1178_v51, %v983_v37  ;;  %v984_v45 = vadd.f32 %v874_v44, %v676_v42  ;;  %v1182_v54 = vsel %vm483_vm0, %v1180_v24, %v1181_v57  ;;  %v1490_v48 = vrot.slane %v1349_v30, 2  ;;  %v94_v44 = vld [vmem:[#allocation6 + $0x1c8] sm:$0xff] }
 0x172   :  { %2269 = vst [vmem:[#allocation7 + $0x170] sm:$0xff] %v2215_v50  ;;  %v1797_v47 = vrot.slane %v1657_v40, 2  ;;  %v1965_v9 = vmul.f32 %v2481_v46, %v3934_v27  ;;  %v1966_v38 = vmul.f32 %v2481_v46, %v3959_v29  ;;  %v1798_v22 = vrot.slane %v1658_v14, 2 }
 0x173   :  { %v1600_v7 = vadd.f32 %v1487_v53, %v1291_v35  ;;  %v1292_v16 = vadd.f32 %v1182_v54, %v984_v45  ;;  %v148_v51 = vmul.f32 %v2423_v5, %v3776_v56  ;;  %v1491_v20 = vsel %vm1408_vm1, %v1489_v28, %v1490_v48  ;;  %v95_v35 = vld [vmem:[#allocation6 + $0x1d0] sm:$0xff] }
 0x174   :  { %v2105_v26 = vrot.slane %v1965_v9, 2  ;;  %v2106_v63 = vrot.slane %v1966_v38, 2  ;;  %v204_v4 = vmul.f32 %v2429_v8, %v3868_v32  ;;  %v1799_v55 = vsel %vm1408_vm1, %v1797_v47, %v1798_v22 }
 0x175   :  { %v1908_v36 = vadd.f32 %v1795_v0, %v1600_v7  ;;  %v1601_v41 = vadd.f32 %v1491_v20, %v1292_v16  ;;  %v314_v21 = vmul.f32 %v2439_v12, %v3959_v29  ;;  %v425_v56 = vmul.f32 %v2441_v13, %v3804_v25 }
 0x176   :  { %v2107_v53 = vsel %vm1408_vm1, %v2105_v26, %v2106_v63  ;;  %v258_v19 = vadd.f32 %v204_v4, %v148_v51  ;;  %v734_v61 = vmul.f32 %v2451_v18, %v3897_v17  ;;  %v3999_v2 = vmul.f32 %v2459_v23, %v3989_v60 }
 0x177   :  { %v2216_v0 = vadd.f32 %v2103_v11, %v1908_v36  ;;  %v1909_v43 = vadd.f32 %v1799_v55, %v1601_v41  ;;  %v4003_v10 = vmul.f32 %v2466_v31, %v3804_v25  ;;  %v567_v6 = vrot.slane %v425_v56, 1 }
 0x178   :  { %v368_v59 = vadd.f32 %v314_v21, %v258_v19  ;;  %v875_v49 = vrot.slane %v734_v61, 1  ;;  %v4007_v1 = vmul.f32 %v2473_v39, %v3897_v17  ;;  %v1183_v3 = vrot.slane %v3999_v2, 1 }
 0x179   :  { %2270 = vst [vmem:[#allocation7 + $0x178] sm:$0x3] %v2216_v0  ;;  %v2217_v34 = vadd.f32 %v2107_v53, %v1909_v43  ;;  %v1492_v11 = vrot.slane %v4003_v10, 2  ;;  %v4013_v52 = vmul.f32 %v2481_v46, %v3989_v60  ;;  %v568_v24 = vsel %vm483_vm0, %v565_v33, %v567_v6 }
 0x17a   :  { %v876_v58 = vsel %vm483_vm0, %v873_v15, %v875_v49  ;;  %v1800_v37 = vrot.slane %v4007_v1, 2  ;;  %v149_v42 = vmul.f32 %v2423_v5, %v3804_v25  ;;  %v677_v50 = vadd.f32 %v568_v24, %v368_v59 }
 0x17b   :  { %2271 = vst [vmem:[#allocation7 + $0x180] sm:$0xff] %v2217_v34  ;;  %v1184_v30 = vsel %vm483_vm0, %v1181_v57, %v1183_v3  ;;  %v1493_v28 = vsel %vm1408_vm1, %v1490_v48, %v1492_v11  ;;  %v2108_v40 = vrot.slane %v4013_v52, 2  ;;  %v205_v15 = vmul.f32 %v2429_v8, %v3897_v17 }
 0x17c   :  { %v1801_v33 = vsel %vm1408_vm1, %v1798_v22, %v1800_v37  ;;  %v315_v25 = vmul.f32 %v2439_v12, %v3989_v60  ;;  %v150_v45 = vmul.f32 %v2423_v5, %v3843_v62  ;;  %v985_v54 = vadd.f32 %v876_v58, %v677_v50 }
 0x17d   :  { %v2109_v57 = vsel %vm1408_vm1, %v2106_v63, %v2108_v40  ;;  %v206_v14 = vmul.f32 %v2429_v8, %v3934_v27  ;;  %v316_v48 = vmul.f32 %v2439_v12, %v94_v44  ;;  %v259_v47 = vadd.f32 %v205_v15, %v149_v42 }
 0x17e   :  { %v317_v9 = vmul.f32 %v2439_v12, %v95_v35  ;;  %v426_v38 = vmul.f32 %v2441_v13, %v3843_v62  ;;  %v4043_v7 = vmul.f32 %v2441_v13, %v3868_v32  ;;  %v1293_v16 = vadd.f32 %v1184_v30, %v985_v54 }
 0x17f   :  { %v260_v22 = vadd.f32 %v206_v14, %v150_v45  ;;  %v735_v51 = vmul.f32 %v2451_v18, %v3934_v27  ;;  %v4049_v20 = vmul.f32 %v2451_v18, %v3959_v29  ;;  %v369_v26 = vadd.f32 %v315_v25, %v259_v47 }
 0x180   :  { %v569_v63 = vrot.slane %v426_v38, 1  ;;  %v570_v4 = vrot.slane %v4043_v7, 1  ;;  %v1043_v36 = vmul.f32 %v2459_v23, %v94_v44  ;;  %v1602_v41 = vadd.f32 %v1493_v28, %v1293_v16 }
 0x181   :  { %v370_v55 = vadd.f32 %v316_v48, %v260_v22  ;;  %v877_v21 = vrot.slane %v735_v51, 1  ;;  %v878_v53 = vrot.slane %v4049_v20, 1  ;;  %v678_v19 = vadd.f32 %v567_v6, %v369_v26 }
 0x182   :  { %v571_v56 = vsel %vm483_vm0, %v569_v63, %v570_v4  ;;  %v1044_v61 = vmul.f32 %v2459_v23, %v95_v35  ;;  %v1185_v0 = vrot.slane %v1043_v36, 1  ;;  %v1910_v43 = vadd.f32 %v1801_v33, %v1602_v41 }
 0x183   :  { %v679_v2 = vadd.f32 %v571_v56, %v370_v55  ;;  %v879_v10 = vsel %vm483_vm0, %v877_v21, %v878_v53  ;;  %v1351_v59 = vmul.f32 %v2466_v31, %v3843_v62  ;;  %v986_v34 = vadd.f32 %v875_v49, %v678_v19 }
 0x184   :  { %v1186_v24 = vrot.slane %v1044_v61, 1  ;;  %v1352_v58 = vmul.f32 %v2466_v31, %v3868_v32  ;;  %v1660_v6 = vmul.f32 %v2473_v39, %v3934_v27  ;;  %v2218_v42 = vadd.f32 %v2109_v57, %v1910_v43 }
 0x185   :  { %v987_v50 = vadd.f32 %v879_v10, %v679_v2  ;;  %v1494_v30 = vrot.slane %v1351_v59, 2  ;;  %v1661_v28 = vmul.f32 %v2473_v39, %v3959_v29  ;;  %v1294_v33 = vadd.f32 %v1183_v3, %v986_v34 }
 0x186   :  { %v1187_v15 = vsel %vm483_vm0, %v1185_v0, %v1186_v24  ;;  %v1495_v25 = vrot.slane %v1352_v58, 2  ;;  %v1802_v45 = vrot.slane %v1660_v6, 2  ;;  %2272 = vst [vmem:[#allocation7 + $0x188] sm:$0xff] %v2218_v42  ;;  %v1968_v54 = vmul.f32 %v2481_v46, %v94_v44  ;;  %v96_v44 = vld [vmem:[#allocation6 + $0x1d8] sm:$0xf] }
 0x187   :  { %v1295_v62 = vadd.f32 %v1187_v15, %v987_v50  ;;  %v1803_v49 = vrot.slane %v1661_v28, 2  ;;  %v1969_v14 = vmul.f32 %v2481_v46, %v95_v35  ;;  %v1603_v48 = vadd.f32 %v1492_v11, %v1294_v33 }
 0x188   :  { %v1496_v27 = vsel %vm1408_vm1, %v1494_v30, %v1495_v25  ;;  %v151_v57 = vmul.f32 %v2423_v5, %v3868_v32  ;;  %v207_v3 = vmul.f32 %v2429_v8, %v3959_v29  ;;  %v2110_v7 = vrot.slane %v1968_v54, 2 }
 0x189   :  { %v1604_v47 = vadd.f32 %v1496_v27, %v1295_v62  ;;  %v1804_v38 = vsel %vm1408_vm1, %v1802_v45, %v1803_v49  ;;  %v2111_v16 = vrot.slane %v1969_v14, 2  ;;  %v1911_v22 = vadd.f32 %v1800_v37, %v1603_v48 }
 0x18a   :  { %v261_v51 = vadd.f32 %v207_v3, %v151_v57  ;;  %v428_v11 = vmul.f32 %v2441_v13, %v3897_v17  ;;  %v737_v32 = vmul.f32 %v2451_v18, %v3989_v60  ;;  %v1045_v29 = vmul.f32 %v2459_v23, %v96_v44 }
 0x18b   :  { %v1912_v35 = vadd.f32 %v1804_v38, %v1604_v47  ;;  %v2112_v20 = vsel %vm1408_vm1, %v2110_v7, %v2111_v16  ;;  %v2219_v26 = vadd.f32 %v2108_v40, %v1911_v22  ;;  %v1353_v1 = vmul.f32 %v2466_v31, %v3897_v17 }
 0x18c   :  { %v371_v63 = vadd.f32 %v317_v9, %v261_v51  ;;  %v572_v36 = vrot.slane %v428_v11, 1  ;;  %v880_v41 = vrot.slane %v737_v32, 1  ;;  %v1188_v55 = vrot.slane %v1045_v29, 1 }
 0x18d   :  { %v2220_v37 = vadd.f32 %v2112_v20, %v1912_v35  ;;  %v1662_v13 = vmul.f32 %v2473_v39, %v3989_v60  ;;  %2273 = vst [vmem:[#allocation7 + $0x190] sm:$0x3] %v2219_v26  ;;  %v1497_v18 = vrot.slane %v1353_v1, 2  ;;  %v1970_v23 = vmul.f32 %v2481_v46, %v96_v44 }
 0x18e   :  { %v573_v21 = vsel %vm483_vm0, %v570_v4, %v572_v36  ;;  %v152_v52 = vmul.f32 %v2423_v5, %v3897_v17  ;;  %v881_v9 = vsel %vm483_vm0, %v878_v53, %v880_v41  ;;  %v318_v31 = vmul.f32 %v2439_v12, %v96_v44 }
 0x18f   :  { %2274 = vst [vmem:[#allocation7 + $0x198] sm:$0xff] %v2220_v37  ;;  %v680_v40 = vadd.f32 %v573_v21, %v371_v63  ;;  %v1189_v19 = vsel %vm483_vm0, %v1186_v24, %v1188_v55  ;;  %v1805_v56 = vrot.slane %v1662_v13, 2  ;;  %v208_v39 = vmul.f32 %v2429_v8, %v3989_v60 }
 0x190   :  { %v1498_v4 = vsel %vm1408_vm1, %v1495_v25, %v1497_v18  ;;  %v2113_v0 = vrot.slane %v1970_v23, 2 }
 0x191   :  { %v988_v61 = vadd.f32 %v881_v9, %v680_v40  ;;  %v262_v46 = vadd.f32 %v208_v39, %v152_v52  ;;  %v1806_v5 = vsel %vm1408_vm1, %v1803_v49, %v1805_v56 }
 0x192   :  { %v2114_v53 = vsel %vm1408_vm1, %v2111_v16, %v2113_v0 }
 0x193   :  { %v1296_v43 = vadd.f32 %v1189_v19, %v988_v61  ;;  %v372_v17 = vadd.f32 %v318_v31, %v262_v46 }
 0x195   :  { %v1605_v2 = vadd.f32 %v1498_v4, %v1296_v43  ;;  %v681_v10 = vadd.f32 %v572_v36, %v372_v17 }
 0x197   :  { %v1913_v12 = vadd.f32 %v1806_v5, %v1605_v2  ;;  %v989_v59 = vadd.f32 %v880_v41, %v681_v10 }
 0x199   :  { %v2221_v34 = vadd.f32 %v2114_v53, %v1913_v12  ;;  %v1297_v24 = vadd.f32 %v1188_v55, %v989_v59 }
 0x19b   :  { %2275 = vst [vmem:[#allocation7 + $0x1a0] sm:$0xff] %v2221_v34  ;;  %v1606_v58 = vadd.f32 %v1497_v18, %v1297_v24 }
 0x19d   :  { %v1914_v8 = vadd.f32 %v1805_v56, %v1606_v58 }
 0x19f   :  { %v2222_v60 = vadd.f32 %v2113_v0, %v1914_v8 }
 0x1a1   :  { %2276 = vst [vmem:[#allocation7 + $0x1a8] sm:$0x3] %v2222_v60 }
 0x1a2   :  { %2351 = shalt.err (!%p2348_p1)
}
 0x1a3   :  { %s2352_s17 = scalar_lea.hbm %s4117_s2, 6912 }
 0x1a4   :  { %p2353_p2 = scmp.ne.s32.totalorder %s4117_s2, %s2352_s17  ;;  %p2356_p3 = scmp.lt.u32.totalorder %s2352_s17, %s4117_s2 }
 0x1a6   :  { %p2358_p4 = pnand %p2356_p3, %p2353_p2 }
 0x1a8   :  { %2361 = shalt.err (!%p2358_p4)
}
 0x1a9   :  { %2288 = dma.vmem_to_hbm [thread:$0]  %s2283_s13, 6912, %s4117_s2, [#allocation4], %s2370_s0, %s2370_s0, %s2371_s29  }
 0x1aa   :  { %2366 = dma.done.wait [#allocation4], 6912  }
 0x1ab   :  { %2367 = vsyncadd [#allocation4], 4294960384 }
 0x1ac   :  { %2292 = vsyncpa [#allocation3], 1 }
 0x1ad   :  { %2293 = vsyncpa [#allocation4], 1 }
 0x1ae   :  { %2294 = vsyncpa [#allocation5], 1 }

</bundles_post_ra>
